<compile_context>
chip_gen: v5e
topology: v5e:2x2
jax: 0.10.0
libtpu: 0.0.40
codegen_flags: <defaults>
</compile_context>

<pallas_src>
import jax
import jax.numpy as jnp
from jax import lax
from jax.experimental import pallas as pl
from jax.experimental.pallas import tpu as pltpu

# ----------------------------- configuration -------------------------------
B = 2            # per-branch batch
S = 8            # sequence length
H = 128          # hidden size        (bert: 768)
NH = 2           # attention heads    (bert: 12)
DH = H // NH     # head dim
I = 256          # intermediate size  (bert: 3072)
L = 2            # encoder layers     (bert: 12)
VOCAB = 100
MAXPOS = 16
TYPES = 2
OUT = 64         # projection head output (bert head: 256)
OUT_PAD = 128    # lane-dense padded head width
LN_EPS = 1e-12
MASK_BIAS = -10000.0
NB = 2 * B       # combined siamese batch
BT = NB * S      # total token rows (32)

WDTYPE = jnp.bfloat16   # matmul operand dtype (weights + pre-dot activation cast)


# ----------------------------- in-kernel helpers ---------------------------
def _ln(x, g, b):
    # f32 LayerNorm statistics (LN_EPS=1e-12 would vanish in bf16)
    mean = jnp.mean(x, axis=-1, keepdims=True)
    var = jnp.mean((x - mean) ** 2, axis=-1, keepdims=True)
    return (x - mean) * lax.rsqrt(var + LN_EPS) * g + b


def _gelu(x):
    # tanh-approx GELU (HF BERT uses erf-GELU; deviation < 1e-3)
    return 0.5 * x * (1.0 + jnp.tanh(0.7978845608028654 * (x + 0.044715 * x * x * x)))


# ------------------------------ fused kernel -------------------------------
def _encoder_kernel(
    x_emb_ref, bias_ref, emb_g_ref, emb_b_ref,
    wqkv_ref, bqkv_ref, wo_ref, bo_ref, ln1_g_ref, ln1_b_ref,
    wi_ref, bi_ref, wf_ref, bf_ref, ln2_g_ref, ln2_b_ref,
    pool_w_ref, pool_b_ref, head_w_ref, head_b_ref,
    out_ref,
    x_sc,
):
    l = pl.program_id(0)

    @pl.when(l == 0)
    def _():
        # embedding LayerNorm; activations become VMEM-resident for all layers
        x_sc[...] = _ln(x_emb_ref[...], emb_g_ref[...], emb_b_ref[...])

    x = x_sc[...]                                              # (BT, H) f32

    # ---- fused QKV projection: one bf16 (BT,H)@(H,3H) MXU issue, f32 acc ----
    qkv = jnp.dot(x.astype(WDTYPE), wqkv_ref[...],
                  preferred_element_type=jnp.float32) + bqkv_ref[...]   # (BT,3H)
    scale = 1.0 / (DH ** 0.5)
    bias = bias_ref[...]                                       # (NB, 1, S) f32

    # ---- multi-head attention: batched over the combined batch via 3-D
    #      einsums; one Q/K/V lane slice per head per layer (not per batch);
    #      softmax statistics in f32; reciprocal on the EUP slot.            ----
    ctx_heads = []
    for h in range(NH):                      # static unroll over heads only
        c0 = h * DH
        qh = qkv[:, c0:c0 + DH].astype(WDTYPE).reshape(NB, S, DH)
        kh = qkv[:, H + c0:H + c0 + DH].astype(WDTYPE).reshape(NB, S, DH)
        vh = qkv[:, 2 * H + c0:2 * H + c0 + DH].astype(WDTYPE).reshape(NB, S, DH)
        s = jnp.einsum('bqd,bkd->bqk', qh, kh,
                       preferred_element_type=jnp.float32) * scale + bias
        s = s - jnp.max(s, axis=-1, keepdims=True)
        p = jnp.exp(s)
        p = p * pl.reciprocal(jnp.sum(p, axis=-1, keepdims=True), approx=True)
        ctx_h = jnp.einsum('bqk,bkd->bqd', p.astype(WDTYPE), vh,
                           preferred_element_type=jnp.float32)          # (NB,S,DH)
        ctx_heads.append(ctx_h.reshape(BT, DH))
    ctx = jnp.concatenate(ctx_heads, axis=-1)                  # (BT, H) lane-dense

    attn = jnp.dot(ctx.astype(WDTYPE), wo_ref[...],
                   preferred_element_type=jnp.float32) + bo_ref[...]
    x = _ln(x + attn, ln1_g_ref[...], ln1_b_ref[...])          # f32 residual + LN

    # NOTE: at bert-base scale, wi/wf should get pl.Buffered(3) (v6e weight
    # streaming) and/or a K-tiled inner grid axis to keep per-step VMEM small.
    h1 = _gelu(jnp.dot(x.astype(WDTYPE), wi_ref[...],
                       preferred_element_type=jnp.float32) + bi_ref[...])
    ffn = jnp.dot(h1.astype(WDTYPE), wf_ref[...],
                  preferred_element_type=jnp.float32) + bf_ref[...]
    x = _ln(x + ffn, ln2_g_ref[...], ln2_b_ref[...])
    x_sc[...] = x

    # ---- epilogue fused into the last layer: pooler + dropout(id) + head ----
    @pl.when(l == pl.num_programs(0) - 1)
    def _():
        cls = x_sc[pl.ds(0, NB, stride=S), :]                  # strided CLS gather
        pooled = jnp.tanh(jnp.dot(cls.astype(WDTYPE), pool_w_ref[...],
                                  preferred_element_type=jnp.float32)
                          + pool_b_ref[...])
        # TODO(synk): training-mode dropout(0.3) not implemented (eval identity).
        out = jnp.dot(pooled.astype(WDTYPE), head_w_ref[...],
                      preferred_element_type=jnp.float32) + head_b_ref[...]
        out_ref[...] = jnp.maximum(out, 0.0)   # 128-lane-dense store; slice outside


# ------------------------------ pallas wrapper ------------------------------
def _layer_spec(*shape):
    # per-layer stacked weight [L, *shape]; leading dim squeezed in the kernel
    return pl.BlockSpec((None,) + shape, lambda l, n=len(shape): (l,) + (0,) * n)


def _const_spec(*shape):
    return pl.BlockSpec(shape, lambda l, n=len(shape): (0,) * n)


def encoder_forward(params, x_emb, bias):
    # NOTE(v7x): a leading size-2 "parallel" grid axis over the two siamese
    # branches would use the second TensorCore; kept concatenated here (1 TC
    # on v5e/v6e, and the split only adds per-step overhead at this size).
    call = pl.pallas_call(
        _encoder_kernel,
        out_shape=jax.ShapeDtypeStruct((NB, OUT_PAD), jnp.float32),
        grid=(L,),
        in_specs=[
            _const_spec(BT, H),          # x_emb (f32)
            _const_spec(NB, 1, S),       # attention bias (f32)
            _const_spec(1, H),           # emb_ln_g
            _const_spec(1, H),           # emb_ln_b
            _layer_spec(H, 3 * H),       # wqkv (bf16)
            _layer_spec(1, 3 * H),       # bqkv
            _layer_spec(H, H),           # wo (bf16)
            _layer_spec(1, H),           # bo
            _layer_spec(1, H),           # ln1_g
            _layer_spec(1, H),           # ln1_b
            _layer_spec(H, I),           # wi (bf16)
            _layer_spec(1, I),           # bi
            _layer_spec(I, H),           # wf (bf16)
            _layer_spec(1, H),           # bf
            _layer_spec(1, H),           # ln2_g
            _layer_spec(1, H),           # ln2_b
            _const_spec(H, H),           # pooler_w (bf16)
            _const_spec(1, H),           # pooler_b
            _const_spec(H, OUT_PAD),     # head_w (bf16, zero-padded to 128 lanes)
            _const_spec(1, OUT_PAD),     # head_b (zero-padded)
        ],
        out_specs=pl.BlockSpec((NB, OUT_PAD), lambda l: (0, 0)),
        scratch_shapes=[
            pltpu.VMEM((BT, H), jnp.float32),   # resident f32 activations
        ],
        compiler_params=pltpu.CompilerParams(
            dimension_semantics=("arbitrary",),   # layer axis carries state
            vmem_limit_bytes=32 * 1024 * 1024,    # explicit budget (v7x-safe)
        ),
    )
    return call(
        x_emb, bias, params["emb_ln_g"], params["emb_ln_b"],
        params["wqkv"], params["bqkv"], params["wo"], params["bo"],
        params["ln1_g"], params["ln1_b"], params["wi"], params["bi"],
        params["wf"], params["bf"], params["ln2_g"], params["ln2_b"],
        params["pooler_w"], params["pooler_b"],
        params["head_w"], params["head_b"],
    )


# -------------------------- parameter construction -------------------------
def init_params(key):
    keys = iter(jax.random.split(key, 32))

    def nrm(shape, dtype=jnp.float32):
        return (0.02 * jax.random.normal(next(keys), shape, jnp.float32)).astype(dtype)

    head_w = jnp.pad(nrm((H, OUT)), ((0, 0), (0, OUT_PAD - OUT))).astype(WDTYPE)
    return {
        "word_emb": nrm((VOCAB, H)),
        "pos_emb": nrm((MAXPOS, H)),
        "type_emb": nrm((TYPES, H)),
        "emb_ln_g": jnp.ones((1, H), jnp.float32),
        "emb_ln_b": jnp.zeros((1, H), jnp.float32),
        "wqkv": nrm((L, H, 3 * H), WDTYPE),
        "bqkv": jnp.zeros((L, 1, 3 * H), jnp.float32),
        "wo": nrm((L, H, H), WDTYPE),
        "bo": jnp.zeros((L, 1, H), jnp.float32),
        "ln1_g": jnp.ones((L, 1, H), jnp.float32),
        "ln1_b": jnp.zeros((L, 1, H), jnp.float32),
        "wi": nrm((L, H, I), WDTYPE),
        "bi": jnp.zeros((L, 1, I), jnp.float32),
        "wf": nrm((L, I, H), WDTYPE),
        "bf": jnp.zeros((L, 1, H), jnp.float32),
        "ln2_g": jnp.ones((L, 1, H), jnp.float32),
        "ln2_b": jnp.zeros((L, 1, H), jnp.float32),
        "pooler_w": nrm((H, H), WDTYPE),
        "pooler_b": jnp.zeros((1, H), jnp.float32),
        "head_w": head_w,
        "head_b": jnp.zeros((1, OUT_PAD), jnp.float32),
    }


# ------------------------------- forward -----------------------------------
def siamese_bert_forward(params, ids1, mask1, ids2, mask2):
    # siamese branches share weights -> run as one concatenated batch
    ids = jnp.concatenate([ids1, ids2], axis=0)          # (NB, S)
    mask = jnp.concatenate([mask1, mask2], axis=0)       # (NB, S)

    # embeddings (gather is glue, plain JAX); token_type_ids = 0
    tok = jnp.take(params["word_emb"], ids, axis=0)      # (NB, S, H)
    pos = params["pos_emb"][:S][None, :, :]
    typ = params["type_emb"][0][None, None, :]
    x_emb = (tok + pos + typ).reshape(BT, H)

    bias = ((1.0 - mask.astype(jnp.float32)) * MASK_BIAS).reshape(NB, 1, S)

    out = encoder_forward(params, x_emb, bias)[:, :OUT]  # slice off lane padding
    return out[:B], out[B:]


# --------------------------------- main -------------------------------------
if __name__ == "__main__":
    key = jax.random.PRNGKey(0)
    k_param, k_ids1, k_ids2 = jax.random.split(key, 3)
    params = init_params(k_param)

    ids1 = jax.random.randint(k_ids1, (B, S), 0, VOCAB, dtype=jnp.int32)
    ids2 = jax.random.randint(k_ids2, (B, S), 0, VOCAB, dtype=jnp.int32)
    mask1 = jnp.ones((B, S), jnp.int32).at[:, -2:].set(0)   # last 2 tokens padded
    mask2 = jnp.ones((B, S), jnp.int32)

    fwd = jax.jit(siamese_bert_forward)
    out1, out2 = fwd(params, ids1, mask1, ids2, mask2)
    jax.block_until_ready((out1, out2))

    assert out1.shape == (B, OUT) and out2.shape == (B, OUT)
    assert bool(jnp.all(out1 >= 0.0)) and bool(jnp.all(out2 >= 0.0))  # ReLU output
    assert bool(jnp.all(jnp.isfinite(out1))) and bool(jnp.all(jnp.isfinite(out2)))
    print("KERNEL_OK")
</pallas_src>

<mosaic_0001>
module attributes {stable_mosaic.version = 11 : i64} {
  func.func @_encoder_kernel(%arg0: i32, %arg1: memref<32x128xf32, #tpu.memory_space<vmem>>, %arg2: memref<4x1x8xf32, #tpu.memory_space<vmem>>, %arg3: memref<1x128xf32, #tpu.memory_space<vmem>>, %arg4: memref<1x128xf32, #tpu.memory_space<vmem>>, %arg5: memref<1x128x384xbf16, #tpu.memory_space<vmem>>, %arg6: memref<1x1x384xf32, #tpu.memory_space<vmem>>, %arg7: memref<1x128x128xbf16, #tpu.memory_space<vmem>>, %arg8: memref<1x1x128xf32, #tpu.memory_space<vmem>>, %arg9: memref<1x1x128xf32, #tpu.memory_space<vmem>>, %arg10: memref<1x1x128xf32, #tpu.memory_space<vmem>>, %arg11: memref<1x128x256xbf16, #tpu.memory_space<vmem>>, %arg12: memref<1x1x256xf32, #tpu.memory_space<vmem>>, %arg13: memref<1x256x128xbf16, #tpu.memory_space<vmem>>, %arg14: memref<1x1x128xf32, #tpu.memory_space<vmem>>, %arg15: memref<1x1x128xf32, #tpu.memory_space<vmem>>, %arg16: memref<1x1x128xf32, #tpu.memory_space<vmem>>, %arg17: memref<128x128xbf16, #tpu.memory_space<vmem>>, %arg18: memref<1x128xf32, #tpu.memory_space<vmem>>, %arg19: memref<128x128xbf16, #tpu.memory_space<vmem>>, %arg20: memref<1x128xf32, #tpu.memory_space<vmem>>, %arg21: memref<4x128xf32, #tpu.memory_space<vmem>>, %arg22: memref<32x128xf32, #tpu.memory_space<vmem>>) attributes {dimension_semantics = [#tpu.dimension_semantics<arbitrary>], iteration_bounds = array<i64: 2>, scalar_prefetch = 0 : i64, scratch_operands = 1 : i64, tpu.core_type = #tpu.core_type<tc>, window_params = [{pipeline_mode = #tpu.pipeline_mode<synchronous>, transform_indices = @transform_0, window_bounds = array<i64: 32, 128>}, {pipeline_mode = #tpu.pipeline_mode<synchronous>, transform_indices = @transform_1, window_bounds = array<i64: 4, 1, 8>}, {pipeline_mode = #tpu.pipeline_mode<synchronous>, transform_indices = @transform_2, window_bounds = array<i64: 1, 128>}, {pipeline_mode = #tpu.pipeline_mode<synchronous>, transform_indices = @transform_3, window_bounds = array<i64: 1, 128>}, {transform_indices = @transform_4, window_bounds = array<i64: 1, 128, 384>}, {transform_indices = @transform_5, window_bounds = array<i64: 1, 1, 384>}, {transform_indices = @transform_6, window_bounds = array<i64: 1, 128, 128>}, {transform_indices = @transform_7, window_bounds = array<i64: 1, 1, 128>}, {transform_indices = @transform_8, window_bounds = array<i64: 1, 1, 128>}, {transform_indices = @transform_9, window_bounds = array<i64: 1, 1, 128>}, {transform_indices = @transform_10, window_bounds = array<i64: 1, 128, 256>}, {transform_indices = @transform_11, window_bounds = array<i64: 1, 1, 256>}, {transform_indices = @transform_12, window_bounds = array<i64: 1, 256, 128>}, {transform_indices = @transform_13, window_bounds = array<i64: 1, 1, 128>}, {transform_indices = @transform_14, window_bounds = array<i64: 1, 1, 128>}, {transform_indices = @transform_15, window_bounds = array<i64: 1, 1, 128>}, {pipeline_mode = #tpu.pipeline_mode<synchronous>, transform_indices = @transform_16, window_bounds = array<i64: 128, 128>}, {pipeline_mode = #tpu.pipeline_mode<synchronous>, transform_indices = @transform_17, window_bounds = array<i64: 1, 128>}, {pipeline_mode = #tpu.pipeline_mode<synchronous>, transform_indices = @transform_18, window_bounds = array<i64: 128, 128>}, {pipeline_mode = #tpu.pipeline_mode<synchronous>, transform_indices = @transform_19, window_bounds = array<i64: 1, 128>}, {pipeline_mode = #tpu.pipeline_mode<synchronous>, transform_indices = @transform_20, window_bounds = array<i64: 4, 128>}]} {
    %c0_i32 = arith.constant 0 : i32
    %0 = arith.cmpi eq, %arg0, %c0_i32 : i32
    %1 = arith.extui %0 : i1 to i32
    %c0_i32_0 = arith.constant 0 : i32
    %2 = arith.cmpi ne, %1, %c0_i32_0 : i32
    scf.if %2 {
      %c0_71 = arith.constant 0 : index
      %c0_72 = arith.constant 0 : index
      %163 = vector.load %arg1[%c0_71, %c0_72] : memref<32x128xf32, #tpu.memory_space<vmem>>, vector<32x128xf32>
      %c0_73 = arith.constant 0 : index
      %c0_74 = arith.constant 0 : index
      %164 = vector.load %arg3[%c0_73, %c0_74] : memref<1x128xf32, #tpu.memory_space<vmem>>, vector<1x128xf32>
      %c0_75 = arith.constant 0 : index
      %c0_76 = arith.constant 0 : index
      %165 = vector.load %arg4[%c0_75, %c0_76] : memref<1x128xf32, #tpu.memory_space<vmem>>, vector<1x128xf32>
      %cst_77 = arith.constant dense<0.000000e+00> : vector<32xf32>
      %166 = vector.multi_reduction <add>, %163, %cst_77 [1] : vector<32x128xf32> to vector<32xf32>
      %167 = vector.shape_cast %166 : vector<32xf32> to vector<32x1xf32>
      %cst_78 = arith.constant 1.280000e+02 : f32
      %168 = vector.broadcast %cst_78 : f32 to vector<32x1xf32>
      %169 = arith.divf %167, %168 : vector<32x1xf32>
      %170 = vector.broadcast %169 : vector<32x1xf32> to vector<32x128xf32>
      %171 = arith.subf %163, %170 : vector<32x128xf32>
      %172 = arith.mulf %171, %171 : vector<32x128xf32>
      %cst_79 = arith.constant dense<0.000000e+00> : vector<32xf32>
      %173 = vector.multi_reduction <add>, %172, %cst_79 [1] : vector<32x128xf32> to vector<32xf32>
      %174 = vector.shape_cast %173 : vector<32xf32> to vector<32x1xf32>
      %cst_80 = arith.constant 1.280000e+02 : f32
      %175 = vector.broadcast %cst_80 : f32 to vector<32x1xf32>
      %176 = arith.divf %174, %175 : vector<32x1xf32>
      %177 = vector.broadcast %169 : vector<32x1xf32> to vector<32x128xf32>
      %178 = arith.subf %163, %177 : vector<32x128xf32>
      %cst_81 = arith.constant 9.99999996E-13 : f32
      %179 = vector.broadcast %cst_81 : f32 to vector<32x1xf32>
      %180 = arith.addf %176, %179 : vector<32x1xf32>
      %181 = math.rsqrt %180 : vector<32x1xf32>
      %182 = vector.broadcast %181 : vector<32x1xf32> to vector<32x128xf32>
      %183 = arith.mulf %178, %182 : vector<32x128xf32>
      %184 = vector.broadcast %164 : vector<1x128xf32> to vector<32x128xf32>
      %185 = arith.mulf %183, %184 : vector<32x128xf32>
      %186 = vector.broadcast %165 : vector<1x128xf32> to vector<32x128xf32>
      %187 = arith.addf %185, %186 : vector<32x128xf32>
      %c0_82 = arith.constant 0 : index
      %c0_83 = arith.constant 0 : index
      %188 = vector.load %arg22[%c0_82, %c0_83] : memref<32x128xf32, #tpu.memory_space<vmem>>, vector<32x128xf32>
      tpu.vector_store %arg22[%c0_82, %c0_83], %187 {strides = array<i32>} : memref<32x128xf32, #tpu.memory_space<vmem>>, vector<32x128xf32>,
    } else {
    }
    %c0 = arith.constant 0 : index
    %c0_1 = arith.constant 0 : index
    %3 = vector.load %arg22[%c0, %c0_1] : memref<32x128xf32, #tpu.memory_space<vmem>>, vector<32x128xf32>
    %4 = arith.truncf %3 : vector<32x128xf32> to vector<32x128xbf16>
    %c0_2 = arith.constant 0 : index
    %c0_3 = arith.constant 0 : index
    %c0_4 = arith.constant 0 : index
    %5 = vector.load %arg5[%c0_2, %c0_3, %c0_4] : memref<1x128x384xbf16, #tpu.memory_space<vmem>>, vector<1x128x384xbf16>
    %6 = vector.shape_cast %5 : vector<1x128x384xbf16> to vector<128x384xbf16>
    %cst = arith.constant dense<0.000000e+00> : vector<32x384xf32>
    %7 = tpu.matmul %4, %6, %cst {dimension_numbers = #tpu.dot_dimension_numbers<[1], [0], [0], [1], [0, 0, 1, 1], [], []>} : vector<32x128xbf16>, vector<128x384xbf16>, vector<32x384xf32> -> vector<32x384xf32>
    %c0_5 = arith.constant 0 : index
    %c0_6 = arith.constant 0 : index
    %c0_7 = arith.constant 0 : index
    %8 = vector.load %arg6[%c0_5, %c0_6, %c0_7] : memref<1x1x384xf32, #tpu.memory_space<vmem>>, vector<1x1x384xf32>
    %9 = vector.shape_cast %8 : vector<1x1x384xf32> to vector<1x384xf32>
    %10 = vector.broadcast %9 : vector<1x384xf32> to vector<32x384xf32>
    %11 = arith.addf %7, %10 : vector<32x384xf32>
    %c0_8 = arith.constant 0 : index
    %c0_9 = arith.constant 0 : index
    %c0_10 = arith.constant 0 : index
    %12 = vector.load %arg2[%c0_8, %c0_9, %c0_10] : memref<4x1x8xf32, #tpu.memory_space<vmem>>, vector<4x1x8xf32>
    %13 = vector.extract_strided_slice %11 {offsets = [0, 0], sizes = [32, 64], strides = [1, 1]} : vector<32x384xf32> to vector<32x64xf32>
    %14 = arith.truncf %13 : vector<32x64xf32> to vector<32x64xbf16>
    %15 = vector.shape_cast %14 : vector<32x64xbf16> to vector<4x8x64xbf16>
    %16 = vector.extract_strided_slice %11 {offsets = [0, 128], sizes = [32, 64], strides = [1, 1]} : vector<32x384xf32> to vector<32x64xf32>
    %17 = arith.truncf %16 : vector<32x64xf32> to vector<32x64xbf16>
    %18 = vector.shape_cast %17 : vector<32x64xbf16> to vector<4x8x64xbf16>
    %19 = vector.extract_strided_slice %11 {offsets = [0, 256], sizes = [32, 64], strides = [1, 1]} : vector<32x384xf32> to vector<32x64xf32>
    %20 = arith.truncf %19 : vector<32x64xf32> to vector<32x64xbf16>
    %21 = vector.shape_cast %20 : vector<32x64xbf16> to vector<4x8x64xbf16>
    "tpu.trace_start"() <{level = 10 : i32, message = "bqd,bkd->bqk"}> : () -> ()
    %cst_11 = arith.constant dense<0.000000e+00> : vector<4x8x8xf32>
    %22 = tpu.matmul %15, %18, %cst_11 {dimension_numbers = #tpu.dot_dimension_numbers<[2], [2], [1], [1], [0, 0, 0, 1, 1, 1], [0], [0]>} : vector<4x8x64xbf16>, vector<4x8x64xbf16>, vector<4x8x8xf32> -> vector<4x8x8xf32>
    "tpu.trace_stop"() : () -> ()
    %cst_12 = arith.constant 1.250000e-01 : f32
    %23 = vector.broadcast %cst_12 : f32 to vector<4x8x8xf32>
    %24 = arith.mulf %22, %23 : vector<4x8x8xf32>
    %25 = vector.broadcast %12 : vector<4x1x8xf32> to vector<4x8x8xf32>
    %26 = arith.addf %24, %25 : vector<4x8x8xf32>
    %cst_13 = arith.constant dense<0xFF800000> : vector<4x8xf32>
    %27 = vector.multi_reduction <maximumf>, %26, %cst_13 [2] : vector<4x8x8xf32> to vector<4x8xf32>
    %28 = vector.shape_cast %27 : vector<4x8xf32> to vector<4x8x1xf32>
    %29 = vector.broadcast %28 : vector<4x8x1xf32> to vector<4x8x8xf32>
    %30 = arith.subf %26, %29 : vector<4x8x8xf32>
    %31 = math.exp %30 : vector<4x8x8xf32>
    %cst_14 = arith.constant dense<0.000000e+00> : vector<4x8xf32>
    %32 = vector.multi_reduction <add>, %31, %cst_14 [2] : vector<4x8x8xf32> to vector<4x8xf32>
    %33 = vector.shape_cast %32 : vector<4x8xf32> to vector<4x8x1xf32>
    %34 = tpu.reciprocal %33 {approx = true} : vector<4x8x1xf32> -> vector<4x8x1xf32>
    %35 = vector.broadcast %34 : vector<4x8x1xf32> to vector<4x8x8xf32>
    %36 = arith.mulf %31, %35 : vector<4x8x8xf32>
    %37 = arith.truncf %36 : vector<4x8x8xf32> to vector<4x8x8xbf16>
    "tpu.trace_start"() <{level = 10 : i32, message = "bqk,bkd->bqd"}> : () -> ()
    %cst_15 = arith.constant dense<0.000000e+00> : vector<4x8x64xf32>
    %38 = tpu.matmul %37, %21, %cst_15 {dimension_numbers = #tpu.dot_dimension_numbers<[2], [1], [1], [2], [0, 0, 0, 1, 1, 2], [0], [0]>} : vector<4x8x8xbf16>, vector<4x8x64xbf16>, vector<4x8x64xf32> -> vector<4x8x64xf32>
    "tpu.trace_stop"() : () -> ()
    %39 = vector.shape_cast %38 : vector<4x8x64xf32> to vector<32x64xf32>
    %40 = vector.extract_strided_slice %11 {offsets = [0, 64], sizes = [32, 64], strides = [1, 1]} : vector<32x384xf32> to vector<32x64xf32>
    %41 = arith.truncf %40 : vector<32x64xf32> to vector<32x64xbf16>
    %42 = vector.shape_cast %41 : vector<32x64xbf16> to vector<4x8x64xbf16>
    %43 = vector.extract_strided_slice %11 {offsets = [0, 192], sizes = [32, 64], strides = [1, 1]} : vector<32x384xf32> to vector<32x64xf32>
    %44 = arith.truncf %43 : vector<32x64xf32> to vector<32x64xbf16>
    %45 = vector.shape_cast %44 : vector<32x64xbf16> to vector<4x8x64xbf16>
    %46 = vector.extract_strided_slice %11 {offsets = [0, 320], sizes = [32, 64], strides = [1, 1]} : vector<32x384xf32> to vector<32x64xf32>
    %47 = arith.truncf %46 : vector<32x64xf32> to vector<32x64xbf16>
    %48 = vector.shape_cast %47 : vector<32x64xbf16> to vector<4x8x64xbf16>
    "tpu.trace_start"() <{level = 10 : i32, message = "bqd,bkd->bqk"}> : () -> ()
    %cst_16 = arith.constant dense<0.000000e+00> : vector<4x8x8xf32>
    %49 = tpu.matmul %42, %45, %cst_16 {dimension_numbers = #tpu.dot_dimension_numbers<[2], [2], [1], [1], [0, 0, 0, 1, 1, 1], [0], [0]>} : vector<4x8x64xbf16>, vector<4x8x64xbf16>, vector<4x8x8xf32> -> vector<4x8x8xf32>
    "tpu.trace_stop"() : () -> ()
    %cst_17 = arith.constant 1.250000e-01 : f32
    %50 = vector.broadcast %cst_17 : f32 to vector<4x8x8xf32>
    %51 = arith.mulf %49, %50 : vector<4x8x8xf32>
    %52 = vector.broadcast %12 : vector<4x1x8xf32> to vector<4x8x8xf32>
    %53 = arith.addf %51, %52 : vector<4x8x8xf32>
    %cst_18 = arith.constant dense<0xFF800000> : vector<4x8xf32>
    %54 = vector.multi_reduction <maximumf>, %53, %cst_18 [2] : vector<4x8x8xf32> to vector<4x8xf32>
    %55 = vector.shape_cast %54 : vector<4x8xf32> to vector<4x8x1xf32>
    %56 = vector.broadcast %55 : vector<4x8x1xf32> to vector<4x8x8xf32>
    %57 = arith.subf %53, %56 : vector<4x8x8xf32>
    %58 = math.exp %57 : vector<4x8x8xf32>
    %cst_19 = arith.constant dense<0.000000e+00> : vector<4x8xf32>
    %59 = vector.multi_reduction <add>, %58, %cst_19 [2] : vector<4x8x8xf32> to vector<4x8xf32>
    %60 = vector.shape_cast %59 : vector<4x8xf32> to vector<4x8x1xf32>
    %61 = tpu.reciprocal %60 {approx = true} : vector<4x8x1xf32> -> vector<4x8x1xf32>
    %62 = vector.broadcast %61 : vector<4x8x1xf32> to vector<4x8x8xf32>
    %63 = arith.mulf %58, %62 : vector<4x8x8xf32>
    %64 = arith.truncf %63 : vector<4x8x8xf32> to vector<4x8x8xbf16>
    "tpu.trace_start"() <{level = 10 : i32, message = "bqk,bkd->bqd"}> : () -> ()
    %cst_20 = arith.constant dense<0.000000e+00> : vector<4x8x64xf32>
    %65 = tpu.matmul %64, %48, %cst_20 {dimension_numbers = #tpu.dot_dimension_numbers<[2], [1], [1], [2], [0, 0, 0, 1, 1, 2], [0], [0]>} : vector<4x8x8xbf16>, vector<4x8x64xbf16>, vector<4x8x64xf32> -> vector<4x8x64xf32>
    "tpu.trace_stop"() : () -> ()
    %66 = vector.shape_cast %65 : vector<4x8x64xf32> to vector<32x64xf32>
    %67 = tpu.concatenate %39, %66 in 1 : vector<32x64xf32>, vector<32x64xf32> -> vector<32x128xf32>
    %68 = arith.truncf %67 : vector<32x128xf32> to vector<32x128xbf16>
    %c0_21 = arith.constant 0 : index
    %c0_22 = arith.constant 0 : index
    %c0_23 = arith.constant 0 : index
    %69 = vector.load %arg7[%c0_21, %c0_22, %c0_23] : memref<1x128x128xbf16, #tpu.memory_space<vmem>>, vector<1x128x128xbf16>
    %70 = vector.shape_cast %69 : vector<1x128x128xbf16> to vector<128x128xbf16>
    %cst_24 = arith.constant dense<0.000000e+00> : vector<32x128xf32>
    %71 = tpu.matmul %68, %70, %cst_24 {dimension_numbers = #tpu.dot_dimension_numbers<[1], [0], [0], [1], [0, 0, 1, 1], [], []>} : vector<32x128xbf16>, vector<128x128xbf16>, vector<32x128xf32> -> vector<32x128xf32>
    %c0_25 = arith.constant 0 : index
    %c0_26 = arith.constant 0 : index
    %c0_27 = arith.constant 0 : index
    %72 = vector.load %arg8[%c0_25, %c0_26, %c0_27] : memref<1x1x128xf32, #tpu.memory_space<vmem>>, vector<1x1x128xf32>
    %73 = vector.shape_cast %72 : vector<1x1x128xf32> to vector<1x128xf32>
    %74 = vector.broadcast %73 : vector<1x128xf32> to vector<32x128xf32>
    %75 = arith.addf %71, %74 : vector<32x128xf32>
    %76 = arith.addf %3, %75 : vector<32x128xf32>
    %c0_28 = arith.constant 0 : index
    %c0_29 = arith.constant 0 : index
    %c0_30 = arith.constant 0 : index
    %77 = vector.load %arg9[%c0_28, %c0_29, %c0_30] : memref<1x1x128xf32, #tpu.memory_space<vmem>>, vector<1x1x128xf32>
    %78 = vector.shape_cast %77 : vector<1x1x128xf32> to vector<1x128xf32>
    %c0_31 = arith.constant 0 : index
    %c0_32 = arith.constant 0 : index
    %c0_33 = arith.constant 0 : index
    %79 = vector.load %arg10[%c0_31, %c0_32, %c0_33] : memref<1x1x128xf32, #tpu.memory_space<vmem>>, vector<1x1x128xf32>
    %80 = vector.shape_cast %79 : vector<1x1x128xf32> to vector<1x128xf32>
    %cst_34 = arith.constant dense<0.000000e+00> : vector<32xf32>
    %81 = vector.multi_reduction <add>, %76, %cst_34 [1] : vector<32x128xf32> to vector<32xf32>
    %82 = vector.shape_cast %81 : vector<32xf32> to vector<32x1xf32>
    %cst_35 = arith.constant 1.280000e+02 : f32
    %83 = vector.broadcast %cst_35 : f32 to vector<32x1xf32>
    %84 = arith.divf %82, %83 : vector<32x1xf32>
    %85 = vector.broadcast %84 : vector<32x1xf32> to vector<32x128xf32>
    %86 = arith.subf %76, %85 : vector<32x128xf32>
    %87 = arith.mulf %86, %86 : vector<32x128xf32>
    %cst_36 = arith.constant dense<0.000000e+00> : vector<32xf32>
    %88 = vector.multi_reduction <add>, %87, %cst_36 [1] : vector<32x128xf32> to vector<32xf32>
    %89 = vector.shape_cast %88 : vector<32xf32> to vector<32x1xf32>
    %cst_37 = arith.constant 1.280000e+02 : f32
    %90 = vector.broadcast %cst_37 : f32 to vector<32x1xf32>
    %91 = arith.divf %89, %90 : vector<32x1xf32>
    %92 = vector.broadcast %84 : vector<32x1xf32> to vector<32x128xf32>
    %93 = arith.subf %76, %92 : vector<32x128xf32>
    %cst_38 = arith.constant 9.99999996E-13 : f32
    %94 = vector.broadcast %cst_38 : f32 to vector<32x1xf32>
    %95 = arith.addf %91, %94 : vector<32x1xf32>
    %96 = math.rsqrt %95 : vector<32x1xf32>
    %97 = vector.broadcast %96 : vector<32x1xf32> to vector<32x128xf32>
    %98 = arith.mulf %93, %97 : vector<32x128xf32>
    %99 = vector.broadcast %78 : vector<1x128xf32> to vector<32x128xf32>
    %100 = arith.mulf %98, %99 : vector<32x128xf32>
    %101 = vector.broadcast %80 : vector<1x128xf32> to vector<32x128xf32>
    %102 = arith.addf %100, %101 : vector<32x128xf32>
    %103 = arith.truncf %102 : vector<32x128xf32> to vector<32x128xbf16>
    %c0_39 = arith.constant 0 : index
    %c0_40 = arith.constant 0 : index
    %c0_41 = arith.constant 0 : index
    %104 = vector.load %arg11[%c0_39, %c0_40, %c0_41] : memref<1x128x256xbf16, #tpu.memory_space<vmem>>, vector<1x128x256xbf16>
    %105 = vector.shape_cast %104 : vector<1x128x256xbf16> to vector<128x256xbf16>
    %cst_42 = arith.constant dense<0.000000e+00> : vector<32x256xf32>
    %106 = tpu.matmul %103, %105, %cst_42 {dimension_numbers = #tpu.dot_dimension_numbers<[1], [0], [0], [1], [0, 0, 1, 1], [], []>} : vector<32x128xbf16>, vector<128x256xbf16>, vector<32x256xf32> -> vector<32x256xf32>
    %c0_43 = arith.constant 0 : index
    %c0_44 = arith.constant 0 : index
    %c0_45 = arith.constant 0 : index
    %107 = vector.load %arg12[%c0_43, %c0_44, %c0_45] : memref<1x1x256xf32, #tpu.memory_space<vmem>>, vector<1x1x256xf32>
    %108 = vector.shape_cast %107 : vector<1x1x256xf32> to vector<1x256xf32>
    %109 = vector.broadcast %108 : vector<1x256xf32> to vector<32x256xf32>
    %110 = arith.addf %106, %109 : vector<32x256xf32>
    %cst_46 = arith.constant 5.000000e-01 : f32
    %111 = vector.broadcast %cst_46 : f32 to vector<32x256xf32>
    %112 = arith.mulf %111, %110 : vector<32x256xf32>
    %cst_47 = arith.constant 4.471500e-02 : f32
    %113 = vector.broadcast %cst_47 : f32 to vector<32x256xf32>
    %114 = arith.mulf %113, %110 : vector<32x256xf32>
    %115 = arith.mulf %114, %110 : vector<32x256xf32>
    %116 = arith.mulf %115, %110 : vector<32x256xf32>
    %117 = arith.addf %110, %116 : vector<32x256xf32>
    %cst_48 = arith.constant 0.797884583 : f32
    %118 = vector.broadcast %cst_48 : f32 to vector<32x256xf32>
    %119 = arith.mulf %118, %117 : vector<32x256xf32>
    %120 = math.tanh %119 : vector<32x256xf32>
    %cst_49 = arith.constant 1.000000e+00 : f32
    %121 = vector.broadcast %cst_49 : f32 to vector<32x256xf32>
    %122 = arith.addf %121, %120 : vector<32x256xf32>
    %123 = arith.mulf %112, %122 : vector<32x256xf32>
    %124 = arith.truncf %123 : vector<32x256xf32> to vector<32x256xbf16>
    %c0_50 = arith.constant 0 : index
    %c0_51 = arith.constant 0 : index
    %c0_52 = arith.constant 0 : index
    %125 = vector.load %arg13[%c0_50, %c0_51, %c0_52] : memref<1x256x128xbf16, #tpu.memory_space<vmem>>, vector<1x256x128xbf16>
    %126 = vector.shape_cast %125 : vector<1x256x128xbf16> to vector<256x128xbf16>
    %cst_53 = arith.constant dense<0.000000e+00> : vector<32x128xf32>
    %127 = tpu.matmul %124, %126, %cst_53 {dimension_numbers = #tpu.dot_dimension_numbers<[1], [0], [0], [1], [0, 0, 1, 1], [], []>} : vector<32x256xbf16>, vector<256x128xbf16>, vector<32x128xf32> -> vector<32x128xf32>
    %c0_54 = arith.constant 0 : index
    %c0_55 = arith.constant 0 : index
    %c0_56 = arith.constant 0 : index
    %128 = vector.load %arg14[%c0_54, %c0_55, %c0_56] : memref<1x1x128xf32, #tpu.memory_space<vmem>>, vector<1x1x128xf32>
    %129 = vector.shape_cast %128 : vector<1x1x128xf32> to vector<1x128xf32>
    %130 = vector.broadcast %129 : vector<1x128xf32> to vector<32x128xf32>
    %131 = arith.addf %127, %130 : vector<32x128xf32>
    %132 = arith.addf %102, %131 : vector<32x128xf32>
    %c0_57 = arith.constant 0 : index
    %c0_58 = arith.constant 0 : index
    %c0_59 = arith.constant 0 : index
    %133 = vector.load %arg15[%c0_57, %c0_58, %c0_59] : memref<1x1x128xf32, #tpu.memory_space<vmem>>, vector<1x1x128xf32>
    %134 = vector.shape_cast %133 : vector<1x1x128xf32> to vector<1x128xf32>
    %c0_60 = arith.constant 0 : index
    %c0_61 = arith.constant 0 : index
    %c0_62 = arith.constant 0 : index
    %135 = vector.load %arg16[%c0_60, %c0_61, %c0_62] : memref<1x1x128xf32, #tpu.memory_space<vmem>>, vector<1x1x128xf32>
    %136 = vector.shape_cast %135 : vector<1x1x128xf32> to vector<1x128xf32>
    %cst_63 = arith.constant dense<0.000000e+00> : vector<32xf32>
    %137 = vector.multi_reduction <add>, %132, %cst_63 [1] : vector<32x128xf32> to vector<32xf32>
    %138 = vector.shape_cast %137 : vector<32xf32> to vector<32x1xf32>
    %cst_64 = arith.constant 1.280000e+02 : f32
    %139 = vector.broadcast %cst_64 : f32 to vector<32x1xf32>
    %140 = arith.divf %138, %139 : vector<32x1xf32>
    %141 = vector.broadcast %140 : vector<32x1xf32> to vector<32x128xf32>
    %142 = arith.subf %132, %141 : vector<32x128xf32>
    %143 = arith.mulf %142, %142 : vector<32x128xf32>
    %cst_65 = arith.constant dense<0.000000e+00> : vector<32xf32>
    %144 = vector.multi_reduction <add>, %143, %cst_65 [1] : vector<32x128xf32> to vector<32xf32>
    %145 = vector.shape_cast %144 : vector<32xf32> to vector<32x1xf32>
    %cst_66 = arith.constant 1.280000e+02 : f32
    %146 = vector.broadcast %cst_66 : f32 to vector<32x1xf32>
    %147 = arith.divf %145, %146 : vector<32x1xf32>
    %148 = vector.broadcast %140 : vector<32x1xf32> to vector<32x128xf32>
    %149 = arith.subf %132, %148 : vector<32x128xf32>
    %cst_67 = arith.constant 9.99999996E-13 : f32
    %150 = vector.broadcast %cst_67 : f32 to vector<32x1xf32>
    %151 = arith.addf %147, %150 : vector<32x1xf32>
    %152 = math.rsqrt %151 : vector<32x1xf32>
    %153 = vector.broadcast %152 : vector<32x1xf32> to vector<32x128xf32>
    %154 = arith.mulf %149, %153 : vector<32x128xf32>
    %155 = vector.broadcast %134 : vector<1x128xf32> to vector<32x128xf32>
    %156 = arith.mulf %154, %155 : vector<32x128xf32>
    %157 = vector.broadcast %136 : vector<1x128xf32> to vector<32x128xf32>
    %158 = arith.addf %156, %157 : vector<32x128xf32>
    %c0_68 = arith.constant 0 : index
    %c0_69 = arith.constant 0 : index
    %159 = vector.load %arg22[%c0_68, %c0_69] : memref<32x128xf32, #tpu.memory_space<vmem>>, vector<32x128xf32>
    tpu.vector_store %arg22[%c0_68, %c0_69], %158 {strides = array<i32>} : memref<32x128xf32, #tpu.memory_space<vmem>>, vector<32x128xf32>,
    %c1_i32 = arith.constant 1 : i32
    %160 = arith.cmpi eq, %arg0, %c1_i32 : i32
    %161 = arith.extui %160 : i1 to i32
    %c0_i32_70 = arith.constant 0 : i32
    %162 = arith.cmpi ne, %161, %c0_i32_70 : i32
    scf.if %162 {
      %c0_71 = arith.constant 0 : index
      %c0_72 = arith.constant 0 : index
      %163 = tpu.strided_load %arg22[%c0_71, %c0_72] {strides = array<i32: 8, 1>} : memref<32x128xf32, #tpu.memory_space<vmem>>, vector<4x128xf32>
      %164 = arith.truncf %163 : vector<4x128xf32> to vector<4x128xbf16>
      %c0_73 = arith.constant 0 : index
      %c0_74 = arith.constant 0 : index
      %165 = vector.load %arg17[%c0_73, %c0_74] : memref<128x128xbf16, #tpu.memory_space<vmem>>, vector<128x128xbf16>
      %cst_75 = arith.constant dense<0.000000e+00> : vector<4x128xf32>
      %166 = tpu.matmul %164, %165, %cst_75 {dimension_numbers = #tpu.dot_dimension_numbers<[1], [0], [0], [1], [0, 0, 1, 1], [], []>} : vector<4x128xbf16>, vector<128x128xbf16>, vector<4x128xf32> -> vector<4x128xf32>
      %c0_76 = arith.constant 0 : index
      %c0_77 = arith.constant 0 : index
      %167 = vector.load %arg18[%c0_76, %c0_77] : memref<1x128xf32, #tpu.memory_space<vmem>>, vector<1x128xf32>
      %168 = vector.broadcast %167 : vector<1x128xf32> to vector<4x128xf32>
      %169 = arith.addf %166, %168 : vector<4x128xf32>
      %170 = math.tanh %169 : vector<4x128xf32>
      %171 = arith.truncf %170 : vector<4x128xf32> to vector<4x128xbf16>
      %c0_78 = arith.constant 0 : index
      %c0_79 = arith.constant 0 : index
      %172 = vector.load %arg19[%c0_78, %c0_79] : memref<128x128xbf16, #tpu.memory_space<vmem>>, vector<128x128xbf16>
      %cst_80 = arith.constant dense<0.000000e+00> : vector<4x128xf32>
      %173 = tpu.matmul %171, %172, %cst_80 {dimension_numbers = #tpu.dot_dimension_numbers<[1], [0], [0], [1], [0, 0, 1, 1], [], []>} : vector<4x128xbf16>, vector<128x128xbf16>, vector<4x128xf32> -> vector<4x128xf32>
      %c0_81 = arith.constant 0 : index
      %c0_82 = arith.constant 0 : index
      %174 = vector.load %arg20[%c0_81, %c0_82] : memref<1x128xf32, #tpu.memory_space<vmem>>, vector<1x128xf32>
      %175 = vector.broadcast %174 : vector<1x128xf32> to vector<4x128xf32>
      %176 = arith.addf %173, %175 : vector<4x128xf32>
      %cst_83 = arith.constant 0.000000e+00 : f32
      %177 = vector.broadcast %cst_83 : f32 to vector<4x128xf32>
      %178 = arith.maximumf %176, %177 : vector<4x128xf32>
      %c0_84 = arith.constant 0 : index
      %c0_85 = arith.constant 0 : index
      %179 = vector.load %arg21[%c0_84, %c0_85] : memref<4x128xf32, #tpu.memory_space<vmem>>, vector<4x128xf32>
      tpu.vector_store %arg21[%c0_84, %c0_85], %178 {strides = array<i32>} : memref<4x128xf32, #tpu.memory_space<vmem>>, vector<4x128xf32>,
    } else {
    }
    return
  }
  func.func @transform_0(%arg0: i32) -> (i32, i32) {
    %c0_i32 = arith.constant 0 : i32
    %c0_i32_0 = arith.constant 0 : i32
    %c0_i32_1 = arith.constant 0 : i32
    return %c0_i32, %c0_i32_0 : i32, i32
  }
  func.func @transform_1(%arg0: i32) -> (i32, i32, i32) {
    %c0_i32 = arith.constant 0 : i32
    %c0_i32_0 = arith.constant 0 : i32
    %c0_i32_1 = arith.constant 0 : i32
    %c0_i32_2 = arith.constant 0 : i32
    return %c0_i32, %c0_i32_0, %c0_i32_1 : i32, i32, i32
  }
  func.func @transform_2(%arg0: i32) -> (i32, i32) {
    %c0_i32 = arith.constant 0 : i32
    %c0_i32_0 = arith.constant 0 : i32
    %c0_i32_1 = arith.constant 0 : i32
    return %c0_i32, %c0_i32_0 : i32, i32
  }
  func.func @transform_3(%arg0: i32) -> (i32, i32) {
    %c0_i32 = arith.constant 0 : i32
    %c0_i32_0 = arith.constant 0 : i32
    %c0_i32_1 = arith.constant 0 : i32
    return %c0_i32, %c0_i32_0 : i32, i32
  }
  func.func @transform_4(%arg0: i32) -> (i32, i32, i32) {
    %c0_i32 = arith.constant 0 : i32
    %c0_i32_0 = arith.constant 0 : i32
    %c0_i32_1 = arith.constant 0 : i32
    return %arg0, %c0_i32, %c0_i32_0 : i32, i32, i32
  }
  func.func @transform_5(%arg0: i32) -> (i32, i32, i32) {
    %c0_i32 = arith.constant 0 : i32
    %c0_i32_0 = arith.constant 0 : i32
    %c0_i32_1 = arith.constant 0 : i32
    return %arg0, %c0_i32, %c0_i32_0 : i32, i32, i32
  }
  func.func @transform_6(%arg0: i32) -> (i32, i32, i32) {
    %c0_i32 = arith.constant 0 : i32
    %c0_i32_0 = arith.constant 0 : i32
    %c0_i32_1 = arith.constant 0 : i32
    return %arg0, %c0_i32, %c0_i32_0 : i32, i32, i32
  }
  func.func @transform_7(%arg0: i32) -> (i32, i32, i32) {
    %c0_i32 = arith.constant 0 : i32
    %c0_i32_0 = arith.constant 0 : i32
    %c0_i32_1 = arith.constant 0 : i32
    return %arg0, %c0_i32, %c0_i32_0 : i32, i32, i32
  }
  func.func @transform_8(%arg0: i32) -> (i32, i32, i32) {
    %c0_i32 = arith.constant 0 : i32
    %c0_i32_0 = arith.constant 0 : i32
    %c0_i32_1 = arith.constant 0 : i32
    return %arg0, %c0_i32, %c0_i32_0 : i32, i32, i32
  }
  func.func @transform_9(%arg0: i32) -> (i32, i32, i32) {
    %c0_i32 = arith.constant 0 : i32
    %c0_i32_0 = arith.constant 0 : i32
    %c0_i32_1 = arith.constant 0 : i32
    return %arg0, %c0_i32, %c0_i32_0 : i32, i32, i32
  }
  func.func @transform_10(%arg0: i32) -> (i32, i32, i32) {
    %c0_i32 = arith.constant 0 : i32
    %c0_i32_0 = arith.constant 0 : i32
    %c0_i32_1 = arith.constant 0 : i32
    return %arg0, %c0_i32, %c0_i32_0 : i32, i32, i32
  }
  func.func @transform_11(%arg0: i32) -> (i32, i32, i32) {
    %c0_i32 = arith.constant 0 : i32
    %c0_i32_0 = arith.constant 0 : i32
    %c0_i32_1 = arith.constant 0 : i32
    return %arg0, %c0_i32, %c0_i32_0 : i32, i32, i32
  }
  func.func @transform_12(%arg0: i32) -> (i32, i32, i32) {
    %c0_i32 = arith.constant 0 : i32
    %c0_i32_0 = arith.constant 0 : i32
    %c0_i32_1 = arith.constant 0 : i32
    return %arg0, %c0_i32, %c0_i32_0 : i32, i32, i32
  }
  func.func @transform_13(%arg0: i32) -> (i32, i32, i32) {
    %c0_i32 = arith.constant 0 : i32
    %c0_i32_0 = arith.constant 0 : i32
    %c0_i32_1 = arith.constant 0 : i32
    return %arg0, %c0_i32, %c0_i32_0 : i32, i32, i32
  }
  func.func @transform_14(%arg0: i32) -> (i32, i32, i32) {
    %c0_i32 = arith.constant 0 : i32
    %c0_i32_0 = arith.constant 0 : i32
    %c0_i32_1 = arith.constant 0 : i32
    return %arg0, %c0_i32, %c0_i32_0 : i32, i32, i32
  }
  func.func @transform_15(%arg0: i32) -> (i32, i32, i32) {
    %c0_i32 = arith.constant 0 : i32
    %c0_i32_0 = arith.constant 0 : i32
    %c0_i32_1 = arith.constant 0 : i32
    return %arg0, %c0_i32, %c0_i32_0 : i32, i32, i32
  }
  func.func @transform_16(%arg0: i32) -> (i32, i32) {
    %c0_i32 = arith.constant 0 : i32
    %c0_i32_0 = arith.constant 0 : i32
    %c0_i32_1 = arith.constant 0 : i32
    return %c0_i32, %c0_i32_0 : i32, i32
  }
  func.func @transform_17(%arg0: i32) -> (i32, i32) {
    %c0_i32 = arith.constant 0 : i32
    %c0_i32_0 = arith.constant 0 : i32
    %c0_i32_1 = arith.constant 0 : i32
    return %c0_i32, %c0_i32_0 : i32, i32
  }
  func.func @transform_18(%arg0: i32) -> (i32, i32) {
    %c0_i32 = arith.constant 0 : i32
    %c0_i32_0 = arith.constant 0 : i32
    %c0_i32_1 = arith.constant 0 : i32
    return %c0_i32, %c0_i32_0 : i32, i32
  }
  func.func @transform_19(%arg0: i32) -> (i32, i32) {
    %c0_i32 = arith.constant 0 : i32
    %c0_i32_0 = arith.constant 0 : i32
    %c0_i32_1 = arith.constant 0 : i32
    return %c0_i32, %c0_i32_0 : i32, i32
  }
  func.func @transform_20(%arg0: i32) -> (i32, i32) {
    %c0_i32 = arith.constant 0 : i32
    %c0_i32_0 = arith.constant 0 : i32
    %c0_i32_1 = arith.constant 0 : i32
    return %c0_i32, %c0_i32_0 : i32, i32
  }
}

</mosaic_0001>

<bundles_post_ra>
// kernel: siamese_bert_forward.1
= control target key start
LH: loop header
LB: loop body
LE: loop exit
PB: predicated region body
PF: predicated region fallthrough
CT: control target
= control target key end

     0   :  { %s4266_s0 = inlined_call_operand.vmem [shape: f32[32,128], index: 0, kind: input, shape index: {}]   ;;  %s4267_s1 = inlined_call_operand.vmem [shape: f32[4,1,8], index: 1, kind: input, shape index: {}]   ;;  %s4268_s2 = inlined_call_operand.vmem [shape: f32[1,128], index: 2, kind: input, shape index: {}]   ;;  %s4269_s3 = inlined_call_operand.vmem [shape: f32[1,128], index: 3, kind: input, shape index: {}]   ;;  %s4270_s4 = inlined_call_operand.hbm [shape: bf16[2,128,384], index: 4, kind: input, shape index: {}]   ;;  %s4271_s5 = inlined_call_operand.vmem [shape: f32[2,1,384], index: 5, kind: input, shape index: {}]   ;;  %s4272_s6 = inlined_call_operand.hbm [shape: bf16[2,128,128], index: 6, kind: input, shape index: {}]   ;;  %s4273_s7 = inlined_call_operand.vmem [shape: f32[2,1,128], index: 7, kind: input, shape index: {}]   ;;  %s4274_s8 = inlined_call_operand.vmem [shape: f32[2,1,128], index: 8, kind: input, shape index: {}]   ;;  %s4275_s9 = inlined_call_operand.vmem [shape: f32[2,1,128], index: 9, kind: input, shape index: {}]   ;;  %s4276_s10 = inlined_call_operand.vmem [shape: bf16[2,128,256], index: 10, kind: input, shape index: {}]   ;;  %s4277_s11 = inlined_call_operand.vmem [shape: f32[2,1,256], index: 11, kind: input, shape index: {}]   ;;  %s4278_s12 = inlined_call_operand.hbm [shape: bf16[2,256,128], index: 12, kind: input, shape index: {}]   ;;  %s4279_s13 = inlined_call_operand.vmem [shape: f32[2,1,128], index: 13, kind: input, shape index: {}]   ;;  %s4280_s14 = inlined_call_operand.vmem [shape: f32[2,1,128], index: 14, kind: input, shape index: {}]   ;;  %s4281_s15 = inlined_call_operand.vmem [shape: f32[2,1,128], index: 15, kind: input, shape index: {}]   ;;  %s4282_s16 = inlined_call_operand.vmem [shape: bf16[128,128], index: 16, kind: input, shape index: {}]   ;;  %s4283_s17 = inlined_call_operand.vmem [shape: f32[1,128], index: 17, kind: input, shape index: {}]   ;;  %s4284_s18 = inlined_call_operand.vmem [shape: bf16[128,128], index: 18, kind: input, shape index: {}]   ;;  %s4285_s19 = inlined_call_operand.vmem [shape: f32[1,128], index: 19, kind: input, shape index: {}]   ;;  %s4286_s20 = inlined_call_operand.vmem [shape: f32[4,128], index: 20, kind: output, shape index: {}]  }
   0x1   :  { %4298 = sst [smem:[#allocation13_spill]] %s4266_s0 }
   0x2   :  { %4299 = sst [smem:[#allocation14_spill]] %s4267_s1 }
   0x3   :  { %4300 = sst [smem:[#allocation15_spill]] %s4268_s2 }
   0x4   :  { %4301 = sst [smem:[#allocation16_spill]] %s4269_s3 }
   0x5   :  { %4302 = sst [smem:[#allocation17_spill]] %s4270_s4 }
   0x6   :  { %4303 = sst [smem:[#allocation18_spill]] %s4271_s5 }
   0x7   :  { %4304 = sst [smem:[#allocation19_spill]] %s4272_s6 }
   0x8   :  { %4305 = sst [smem:[#allocation20_spill]] %s4278_s12 }
   0x9   :  { %4306 = sst [smem:[#allocation21_spill]] %s4279_s13 }
   0xa   :  { %4307 = sst [smem:[#allocation22_spill]] %s4280_s14 }
   0xb   :  { %4308 = sst [smem:[#allocation23_spill]] %s4281_s15 }
   0xc   :  { %4309 = sst [smem:[#allocation24_spill]] %s4282_s16 }
   0xd   :  { %4310 = sst [smem:[#allocation25_spill]] %s4283_s17 }
   0xe   :  { %4311 = sst [smem:[#allocation26_spill]] %s4284_s18 }
   0xf   :  { %4312 = sst [smem:[#allocation27_spill]] %s4285_s19 }
  0x10   :  { %4313 = sst [smem:[#allocation28_spill]] %s4286_s20 }
  0x11   :  { %25 = vsyncpa [#allocation4], 0 }
  0x12   :  { %27 = vsyncpa [#allocation4 + $0x1], 0 }
  0x13   :  { %28 = vsyncpa [#allocation6], 0 }
  0x14   :  { %30 = vsyncpa [#allocation6 + $0x1], 0  ;;  %s3605_s1 = smov 0   ;;  %s3607_s22 = smov 0  }
  0x15   :  { %s3609_s23 = smov 0   ;;  %s3611_s24 = smov 0  }
  0x16 LB: > { %4314 = sst [smem:[#allocation10_spill]] %s3487_s23  ;;  %s3624_s2 = sadd.s32 4294967295, %s3491_s24   ;;  %s3491_s24 = sphi %s3611_s24, %s4345_s24   ;;  %s3487_s23 = sphi %s3609_s23, %s4347_s23   ;;  %s3483_s22 = sphi %s3607_s22, %s4349_s22   ;;  %s3479_s1 = sphi %s3605_s1, %s4348_s1  }
  0x17   : > { %s3627_s25 = sadd.s32 1, %s3491_s24   ;;  %s127_s26 = sadd.s32 1, %s3487_s23 }
  0x18   : > { %4315 = sst [smem:[#allocation11_spill]] %s3627_s25  ;;  %s124_s3 = ssub.s32 %s3491_s24, %s3627_s25 }
  0x19   : > { %p125_p0 = scmp.eq.s32.totalorder %s124_s3, 0  ;;  %p134_p1 = scmp.ne.s32.totalorder %s3487_s23, %s3483_s22 }
  0x1a   : > { %p135_p2 = scmp.eq.s32.totalorder %s3491_s24, 0  ;;  %p140_p3 = scmp.ne.s32.totalorder %s3483_s22, %s3479_s1 }
  0x1b   : > { %s3637_s27 = scalar_select %p125_p0, %s3487_s23, %s127_s26  }
  0x1c   : > { %p136_p4 = por %p135_p2, %p134_p1  ;;  %p141_p5 = scmp.eq.s32.totalorder %s3624_s2, 0 }
  0x1d   : > { %4316 = sst [smem:[#allocation12_spill]] %s3637_s27  ;;  %p3221_p6 = scmp.lt.s32.totalorder %s3491_s24, 2 }
  0x1e   : > { %p3641_p7 = por %p141_p5, %p140_p3  ;;  %s3646_s4 = sand.u32 1, %s3487_s23  }
  0x1f   : > { %p3648_p8 = pnand %p3221_p6, %p136_p4  ;;  %s608_s30 = sand.u32 1, %s3491_s24  }
  0x20   : > { %s2766_s0 = sshll.u32 %s3646_s4, 6  ;;  %s3118_s21 = sshll.u32 %s3491_s24, 6 }
  0x21   : > { %s612_s1 = scalar_lea.vmem [#allocation5], %s2766_s0  ;;  %s4319_s6 = sld [smem:[#allocation19_spill]] }
  0x22   : > { %s620_s3 = sshll.u32 %s612_s1, 4  ;;  %s3658_s23 = scalar_lea.sflag [#allocation6], %s608_s30  ;;  %s621_s3 = int_to_ptr.vmem [resolvable:$true] %s620_s3 }
  0x23   : > { %p3367_p10 = pneg %p3648_p8 }
  0x27   : > { %s617_s25 = scalar_lea.hbm %s4319_s6, %s3118_s21  ;;  %s3370_s27 = scalar_lea.hbm %s4319_s6, 128 }
  0x28   : > { %s618_s20 = sshll.u32 %s617_s25, 4  ;;  %s619_s20 = int_to_ptr.hbm [resolvable:$true] %s618_s20 }
  0x29   : > { %s3363_s19 = sshra.s32 %s619_s20, 4  ;;  %s3364_s19 = int_to_ptr.hbm [resolvable:$true] %s3363_s19 }
  0x2a   : > { %s3365_s17 = scalar_lea.hbm %s3364_s19, 64  ;;  %p3371_p13 = scmp.lt.s32.totalorder %s3364_s19, %s4319_s6 }
  0x2b   : > { %p3366_p9 = scmp.ne.s32.totalorder %s3364_s19, %s3365_s17  ;;  %p3372_p0 = scmp.lt.s32.totalorder %s3370_s27, %s3365_s17 }
  0x2d   : > { %p3368_p11 = pnand %p3367_p10, %p3366_p9  ;;  %p3373_p1 = por %p3372_p0, %p3371_p13 }
  0x2f   : > { %p3369_p12 = pneg %p3368_p11 }
  0x31   : > { %p3374_p2 = pnand %p3373_p1, %p3369_p12 }
  0x33   : > { %3377 = shalt.err (!%p3374_p2)
}
  0x34   : > { %s4295_s25 = smov 64   ;;  %s4296_s30 = smov 4  }
  0x35   : > { %3217 = dma.hbm_to_vmem [thread:$0]  (!%p3648_p8), %s619_s20, 1024, %s621_s3, %s3658_s23, %s4295_s25, %s4295_s25, %s4296_s30  }
  0x36   : > { %p2772_p3 = scmp.ge.s32.totalorder %s3491_s24, 1  ;;  %p701_p4 = scmp.lt.s32.totalorder %s3491_s24, 3 }
  0x37   : > { %s3201_s17 = smul.u32 192, %s3646_s4  ;;  %s4321_s21 = sld [smem:[#allocation17_spill]] }
  0x38   : > { %p3680_p5 = pnand %p2772_p3, %p701_p4  ;;  %s3202_s0 = smul.u32 192, %s3491_s24 }
  0x39   : > { %s583_s6 = scalar_lea.vmem [#allocation3], %s3201_s17  ;;  %s580_s15 = scalar_lea.sflag [#allocation4], %s3646_s4 }
  0x3a   : > { %s591_s18 = sshll.u32 %s583_s6, 4  ;;  %s592_s18 = int_to_ptr.vmem [resolvable:$true] %s591_s18 }
  0x3d   : > { %s588_s26 = scalar_lea.hbm %s4321_s21, %s3202_s0  ;;  %s3400_s14 = scalar_lea.hbm %s4321_s21, 384 }
  0x3e   : > { %s589_s16 = sshll.u32 %s588_s26, 4  ;;  %s590_s16 = int_to_ptr.hbm [resolvable:$true] %s589_s16 }
  0x3f   : > { %s3393_s20 = sshra.s32 %s590_s16, 4  ;;  %s3394_s20 = int_to_ptr.hbm [resolvable:$true] %s3393_s20 }
  0x40   : > { %s3395_s3 = scalar_lea.hbm %s3394_s20, 192  ;;  %p3401_p12 = scmp.lt.s32.totalorder %s3394_s20, %s4321_s21 }
  0x41   : > { %p3396_p6 = scmp.ne.s32.totalorder %s3394_s20, %s3395_s3  ;;  %p3402_p13 = scmp.lt.s32.totalorder %s3400_s14, %s3395_s3 }
  0x43   : > { %p3398_p9 = pnand %p3396_p6, %p3367_p10  ;;  %p3403_p0 = por %p3402_p13, %p3401_p12 }
  0x45   : > { %p3399_p11 = pneg %p3398_p9 }
  0x47   : > { %p3404_p1 = pnand %p3403_p0, %p3399_p11 }
  0x49   : > { %3407 = shalt.err (!%p3404_p1)
}
  0x4a   : > { %s3495_s6 = smov 192   ;;  %s3496_s17 = smov 12  }
  0x4b   : > { %3214 = dma.hbm_to_vmem [thread:$0]  (!%p3648_p8), %s590_s16, 3072, %s592_s18, %s580_s15, %s3495_s6, %s3495_s6, %s3496_s17  }
  0x4c   : > { %s2769_s27 = sshll.u32 %s3646_s4, 7  ;;  %s3119_s26 = sshll.u32 %s3491_s24, 7 }
  0x4d   : > { %s4322_s12 = sld [smem:[#allocation20_spill]]  ;;  %s667_s20 = scalar_lea.vmem [#allocation7], %s2769_s27 }
  0x4e   : > { %s675_s14 = sshll.u32 %s667_s20, 4  ;;  %s676_s14 = int_to_ptr.vmem [resolvable:$true] %s675_s14 }
  0x53   : > { %s672_s13 = scalar_lea.hbm %s4322_s12, %s3119_s26  ;;  %s3430_s18 = scalar_lea.hbm %s4322_s12, 256 }
  0x54   : > { %s673_s1 = sshll.u32 %s672_s13, 4  ;;  %s674_s1 = int_to_ptr.hbm [resolvable:$true] %s673_s1 }
  0x55   : > { %s3423_s3 = sshra.s32 %s674_s1, 4  ;;  %s3424_s3 = int_to_ptr.hbm [resolvable:$true] %s3423_s3 }
  0x56   : > { %s3425_s0 = scalar_lea.hbm %s3424_s3, 128  ;;  %p3431_p6 = scmp.lt.s32.totalorder %s3424_s3, %s4322_s12 }
  0x57   : > { %p3426_p2 = scmp.ne.s32.totalorder %s3424_s3, %s3425_s0  ;;  %p3432_p9 = scmp.lt.s32.totalorder %s3430_s18, %s3425_s0 }
  0x59   : > { %p3428_p3 = pnand %p3426_p2, %p3367_p10  ;;  %p3433_p11 = por %p3432_p9, %p3431_p6 }
  0x5b   : > { %p3429_p4 = pneg %p3428_p3 }
  0x5d   : > { %p3434_p12 = pnand %p3433_p11, %p3429_p4 }
  0x5f   : > { %3437 = shalt.err (!%p3434_p12)
}
  0x60   : > { %s4323_s13 = smov 4   ;;  %s4324_s6 = smov 64  }
  0x61   : > { %3220 = dma.hbm_to_vmem [thread:$0]  (!%p3648_p8), %s674_s1, 2048, %s676_s14, %s3658_s23, %s4324_s6, %s4324_s6, %s4323_s13  }
  0x62   : > { %705 = sbr.rel (%p3680_p5) target bundleno = 2947 (0xb83), region = 100  ;;  %s707_s17 = sand.u32 (!%p3680_p5), 1, %s3483_s22  }
  0x63   : > { %s3203_s27 = smul.u32 (!%p3680_p5), 192, %s707_s17  ;;  %s708_s26 = scalar_lea.sflag (!%p3680_p5), [#allocation4], %s707_s17 }
  0x65   : > { %s3723_s25 = scalar_lea.vmem (!%p3680_p5), [#allocation3], %s3203_s27 }
  0x67   : > { %3470 = dma.done.wait (%p3641_p7), %s708_s26, 3072  }
  0x68   : > { %3472 = vsyncadd (%p3641_p7), %s708_s26, 4294964224  ;;  %s717_s29 = sand.u32 1, %s3624_s2   ;;  %s2773_s30 = sshll.u32 %s707_s17, 6 }
  0x69   : > { %s718_s23 = scalar_lea.sflag [#allocation6], %s717_s29  ;;  %s3730_s1 = scalar_lea.vmem [#allocation5], %s2773_s30 }
  0x6a   : > { %3474 = dma.done.wait (%p3641_p7), %s718_s23, 3072  }
  0x6b   : > { %3476 = vsyncadd (%p3641_p7), %s718_s23, 4294964224  ;;  %s2774_s19 = sshll.u32 %s707_s17, 7  ;;  %p825_p8 = scmp.lt.s32.totalorder %s3624_s2, 1 }
  0x6c   : > { %s4325_s5 = sld [smem:[#allocation18_spill]]  ;;  %p2778_p7 = scmp.ne.s32.totalorder %s3624_s2, 0 }
  0x6d   : > { %s3738_s20 = scalar_select %p825_p8, %s3624_s2, 1 }
  0x6e   : > { %s4326_s4 = sld [smem:[#allocation21_spill]] }
  0x6f   : > { %s3204_s14 = smul.u32 3, %s3738_s20  ;;  %s3120_s26 = sshll.u32 %s3738_s20, 7 }
  0x70   : > { %s3762_s23 = scalar_lea.vmem %s4276_s10, %s3120_s26  ;;  %s2777_s3 = sshll.u32 %s3738_s20, 1 }
  0x71   : > { %s3768_s15 = scalar_lea.vmem %s4277_s11, %s2777_s3  ;;  %s4328_s21 = sld [smem:[#allocation23_spill]] }
  0x72   : > { %s3756_s27 = scalar_lea.vmem %s4325_s5, %s3204_s14  ;;  %s4327_s14 = sld [smem:[#allocation22_spill]] }
  0x73   : > { %s3782_s26 = scalar_lea.vmem [#allocation7], %s2774_s19  ;;  %s4329_s3 = sld [smem:[#allocation13_spill]] (!%p2778_p7) }
  0x74   : > { %s849_s13 = scalar_lea.vmem %s4326_s4, %s3738_s20  ;;  %860 = sbr.rel (%p2778_p7) target bundleno = 398 (0x18e), region = 116 }
  0x75   : > { %s4330_s4 = sld [smem:[#allocation15_spill]] (!%p2778_p7) }
  0x76   : > { %s4331_s28 = sld [smem:[#allocation16_spill]] (!%p2778_p7) }
  0x77   : > { %s855_s29 = scalar_lea.vmem %s4328_s21, %s3738_s20 }
  0x78   : > { %s852_s17 = scalar_lea.vmem %s4327_s14, %s3738_s20 }
  0x79   : > { %v863_v0 = vld [vmem:[%s4329_s3 + $0x10] sm:$0xff]  ;;  %v861_v1 = vld [vmem:[%s4329_s3] sm:$0xff]  ;;  %v864_v2 = vld [vmem:[%s4329_s3 + $0x18] sm:$0xff]  ;;  %v3497_v4 = vmov 128.0  }
  0x7a   : > { %871 = vadd.xlane.f32.xlu1 %v863_v0  ;;  %867 = vadd.xlane.f32.xlu0 %v861_v1  ;;  %v862_v3 = vld [vmem:[%s4329_s3 + $0x8] sm:$0xff]  ;;  %3263 = vrcp.f32 %v3497_v4 }
  0x7b   : > { %v3261_v53 = vld [vmem:[%s4330_s4] ss:$0 sm:$0xff] }
  0x7c   : > { %v3262_v58 = vld [vmem:[%s4331_s28] ss:$0 sm:$0xff] }
  0x80   : > { %v3264_v5 = vpop.eup %3263 }
  0x81   : > { %v876_v6 = vmul.f32 128.0, %v3264_v5  ;;  %vm880_vm0 = vweird.f32 %v3264_v5 }
  0x82   : > { %873 = vadd.xlane.f32.xlu1 %v864_v2  ;;  %869 = vadd.xlane.f32.xlu0 %v862_v3 }
  0x83   : > { %v877_v7 = vsub.f32 1.0, %v876_v6 }
  0x85   : > { %v878_v8 = vmul.f32 %v3264_v5, %v877_v7 }
  0x87   : > { %v879_v9 = vadd.f32 %v3264_v5, %v878_v8 }
  0x89   : > { %v881_v10 = vsel %vm880_vm0, %v3264_v5, %v879_v9 }
  0xed   : > { %v872_v11 = vpop.xlane.xlu1 %871  ;;  %v868_v12 = vpop.xlane.xlu0 %867 }
  0xee   : > { %v884_v13 = vmul.f32 %v881_v10, %v872_v11  ;;  %v882_v14 = vmul.f32 %v881_v10, %v868_v12 }
  0xf0   : > { %v888_v15 = vsub.f32 %v863_v0, %v884_v13  ;;  %v886_v16 = vsub.f32 %v861_v1, %v882_v14 }
  0xf2   : > { %v892_v17 = vmul.f32 %v888_v15, %v888_v15  ;;  %v890_v18 = vmul.f32 %v886_v16, %v886_v16 }
  0xf4   : > { %898 = vadd.xlane.f32.xlu0 %v892_v17  ;;  %894 = vadd.xlane.f32.xlu2 %v890_v18 }
  0xf5   : > { %v874_v19 = vpop.xlane.xlu1 %873  ;;  %v870_v20 = vpop.xlane.xlu0 %869 }
  0xf6   : > { %v885_v21 = vmul.f32 %v881_v10, %v874_v19  ;;  %v883_v22 = vmul.f32 %v881_v10, %v870_v20 }
  0xf8   : > { %v3797_v23 = vsub.f32 %v864_v2, %v885_v21  ;;  %v3799_v24 = vsub.f32 %v862_v3, %v883_v22 }
  0xfa   : > { %v893_v25 = vmul.f32 %v3797_v23, %v3797_v23  ;;  %v891_v26 = vmul.f32 %v3799_v24, %v3799_v24 }
  0xfc   : > { %900 = vadd.xlane.f32.xlu1 %v893_v25  ;;  %896 = vadd.xlane.f32.xlu2 %v891_v26 }
 0x167   : > { %v895_v27 = vpop.xlane.xlu2 %894  ;;  %v899_v28 = vpop.xlane.xlu0 %898 }
 0x168   : > { %v902_v29 = vmul.f32 %v895_v27, %v881_v10  ;;  %v904_v30 = vmul.f32 %v899_v28, %v881_v10 }
 0x16a   : > { %v906_v31 = vadd.f32 1e-12, %v902_v29  ;;  %v908_v32 = vadd.f32 1e-12, %v904_v30 }
 0x16c   : > { %3265 = vrsqrt.f32 %v906_v31  ;;  %vm916_vm3 = vweird.f32 %v906_v31  ;;  %vm936_vm5 = vweird.f32 %v908_v32 }
 0x16d   : > { %3267 = vrsqrt.f32 %v908_v32 }
 0x16f   : > { %v901_v33 = vpop.xlane.xlu1 %900  ;;  %v897_v34 = vpop.xlane.xlu2 %896 }
 0x170   : > { %v905_v35 = vmul.f32 %v901_v33, %v881_v10  ;;  %v903_v36 = vmul.f32 %v897_v34, %v881_v10 }
 0x172   : > { %v3266_v37 = vpop.eup %3265  ;;  %v909_v38 = vadd.f32 1e-12, %v905_v35  ;;  %v907_v39 = vadd.f32 1e-12, %v903_v36 }
 0x173   : > { %v3268_v40 = vpop.eup %3267  ;;  %v911_v41 = vmul.f32 %v3266_v37, %v906_v31  ;;  %vm917_vm1 = vweird.f32 %v3266_v37 }
 0x174   : > { %v931_v42 = vmul.f32 %v3268_v40, %v908_v32  ;;  %3269 = vrsqrt.f32 %v909_v38  ;;  %vm937_vm2 = vweird.f32 %v3268_v40  ;;  %vm918_vm4 = vmor %vm916_vm3, %vm917_vm1  ;;  %vm946_vm9 = vweird.f32 %v909_v38 }
 0x175   : > { %v912_v43 = vmul.f32 %v3266_v37, %v911_v41  ;;  %3271 = vrsqrt.f32 %v907_v39  ;;  %vm938_vm6 = vmor %vm936_vm5, %vm937_vm2  ;;  %vm926_vm11 = vweird.f32 %v907_v39 }
 0x176   : > { %v932_v44 = vmul.f32 %v3268_v40, %v931_v42 }
 0x177   : > { %v913_v45 = vmul.f32 0.5, %v912_v43 }
 0x178   : > { %v933_v46 = vmul.f32 0.5, %v932_v44 }
 0x179   : > { %v914_v47 = vsub.f32 1.5, %v913_v45 }
 0x17a   : > { %v3270_v48 = vpop.eup %3269  ;;  %v934_v49 = vsub.f32 1.5, %v933_v46 }
 0x17b   : > { %v3272_v50 = vpop.eup %3271  ;;  %v915_v51 = vmul.f32 %v3266_v37, %v914_v47  ;;  %v941_v52 = vmul.f32 %v3270_v48, %v909_v38  ;;  %vm947_vm7 = vweird.f32 %v3270_v48 }
 0x17c   : > { %v935_v54 = vmul.f32 %v3268_v40, %v934_v49  ;;  %v921_v55 = vmul.f32 %v3272_v50, %v907_v39  ;;  %vm927_vm8 = vweird.f32 %v3272_v50  ;;  %vm948_vm10 = vmor %vm946_vm9, %vm947_vm7 }
 0x17d   : > { %v919_v56 = vsel %vm918_vm4, %v3266_v37, %v915_v51  ;;  %v942_v57 = vmul.f32 %v3270_v48, %v941_v52  ;;  %vm928_vm12 = vmor %vm926_vm11, %vm927_vm8 }
 0x17e   : > { %v950_v59 = vmul.f32 %v919_v56, %v886_v16  ;;  %v939_v60 = vsel %vm938_vm6, %v3268_v40, %v935_v54  ;;  %v922_v61 = vmul.f32 %v3272_v50, %v921_v55 }
 0x17f   : > { %v952_v62 = vmul.f32 %v939_v60, %v888_v15  ;;  %v943_v63 = vmul.f32 0.5, %v942_v57 }
 0x180   : > { %v957_v0 = vmul.f32 %v3261_v53, %v950_v59  ;;  %v923_v1 = vmul.f32 0.5, %v922_v61 }
 0x181   : > { %v959_v2 = vmul.f32 %v3261_v53, %v952_v62  ;;  %v944_v3 = vsub.f32 1.5, %v943_v63 }
 0x182   : > { %v964_v4 = vadd.f32 %v3262_v58, %v957_v0  ;;  %v924_v5 = vsub.f32 1.5, %v923_v1 }
 0x183   : > { %v966_v6 = vadd.f32 %v3262_v58, %v959_v2  ;;  %v945_v7 = vmul.f32 %v3270_v48, %v944_v3 }
 0x184   : > { %968 = vst [vmem:[#allocation2] sm:$0xff] %v964_v4  ;;  %v925_v8 = vmul.f32 %v3272_v50, %v924_v5 }
 0x185   : > { %970 = vst [vmem:[#allocation2 + $0x10] sm:$0xff] %v966_v6  ;;  %v949_v9 = vsel %vm948_vm10, %v3270_v48, %v945_v7 }
 0x186   : > { %v953_v10 = vmul.f32 %v949_v9, %v3797_v23  ;;  %v929_v11 = vsel %vm928_vm12, %v3272_v50, %v925_v8 }
 0x187   : > { %v951_v12 = vmul.f32 %v929_v11, %v3799_v24 }
 0x188   : > { %v960_v13 = vmul.f32 %v3261_v53, %v953_v10 }
 0x189   : > { %v958_v14 = vmul.f32 %v3261_v53, %v951_v12 }
 0x18a   : > { %v967_v15 = vadd.f32 %v3262_v58, %v960_v13 }
 0x18b   : > { %v965_v16 = vadd.f32 %v3262_v58, %v958_v14 }
 0x18c   : > { %971 = vst [vmem:[#allocation2 + $0x18] sm:$0xff] %v967_v15 }
 0x18d   : > { %969 = vst [vmem:[#allocation2 + $0x8] sm:$0xff] %v965_v16 }
 0x18e PF: > { %v2865_v17 = vld [vmem:[%s3723_s25 + $0xa8] sm:$0xf]  ;;  %v3143_v18 = vld [vmem:[%s3723_s25 + $0xb0] sm:$0xf0]  ;;  %v3142_v19 = vld [vmem:[%s3723_s25 + $0xac] sm:$0xf]  ;;  %s4333_s4 = scalar_lea.vmem %s4273_s7, %s3738_s20  ;;  %s4334_s14 = scalar_lea.vmem %s4274_s8, %s3738_s20 }
 0x18f   : > { %v2866_v20 = vor.u32 %v3143_v18, %v2865_v17  ;;  %v2867_v21 = vld [vmem:[%s3723_s25 + $0xb4] sm:$0xf0]  ;;  %v2853_v22 = vld [vmem:[%s3723_s25 + $0x90] sm:$0xf]  ;;  %v3140_v23 = vld [vmem:[%s3723_s25 + $0x98] sm:$0xf0] }
 0x190   : > { %v2870_v24 = vor.u32 %v3142_v19, %v2867_v21  ;;  %v3139_v25 = vld [vmem:[%s3723_s25 + $0x94] sm:$0xf]  ;;  %v2855_v26 = vld [vmem:[%s3723_s25 + $0x9c] sm:$0xf0]  ;;  %v2854_v27 = vor.u32 %v3140_v23, %v2853_v22  ;;  %v2841_v29 = vld [vmem:[%s3723_s25 + $0x78] sm:$0xf] }
 0x191   : > { %1146 = vmatpush.bf16.msra.mxu0 %v2866_v20  ;;  %v2858_v28 = vor.u32 %v3139_v25, %v2855_v26  ;;  %v3137_v30 = vld [vmem:[%s3723_s25 + $0x80] sm:$0xf0]  ;;  %v3136_v31 = vld [vmem:[%s3723_s25 + $0x7c] sm:$0xf]  ;;  %v2843_v32 = vld [vmem:[%s3723_s25 + $0x84] sm:$0xf0] }
 0x192   : > { %1165 = vmatpush.bf16.msra.mxu1 %v2870_v24  ;;  %v2842_v33 = vor.u32 %v3137_v30, %v2841_v29  ;;  %v2846_v34 = vor.u32 %v3136_v31, %v2843_v32  ;;  %v2829_v35 = vld [vmem:[%s3723_s25 + $0x60] sm:$0xf]  ;;  %v3134_v36 = vld [vmem:[%s3723_s25 + $0x68] sm:$0xf0]  ;;  %v3133_v37 = vld [vmem:[%s3723_s25 + $0x64] sm:$0xf] }
 0x193   : > { %v2831_v38 = vld [vmem:[%s3723_s25 + $0x6c] sm:$0xf0]  ;;  %v2817_v39 = vld [vmem:[%s3723_s25 + $0x48] sm:$0xf]  ;;  %v2830_v40 = vor.u32 %v3134_v36, %v2829_v35  ;;  %v3131_v41 = vld [vmem:[%s3723_s25 + $0x50] sm:$0xf0] }
 0x194   : > { %v3130_v42 = vld [vmem:[%s3723_s25 + $0x4c] sm:$0xf]  ;;  %v2819_v43 = vld [vmem:[%s3723_s25 + $0x54] sm:$0xf0]  ;;  %v2834_v44 = vor.u32 %v3133_v37, %v2831_v38  ;;  %v2818_v45 = vor.u32 %v3131_v41, %v2817_v39  ;;  %v2805_v47 = vld [vmem:[%s3723_s25 + $0x30] sm:$0xf] }
 0x195   : > { %1147 = vmatpush.bf16.msra.mxu0 %v2854_v27  ;;  %v2822_v46 = vor.u32 %v3130_v42, %v2819_v43  ;;  %v3128_v48 = vld [vmem:[%s3723_s25 + $0x38] sm:$0xf0]  ;;  %v3127_v49 = vld [vmem:[%s3723_s25 + $0x34] sm:$0xf]  ;;  %v2807_v50 = vld [vmem:[%s3723_s25 + $0x3c] sm:$0xf0] }
 0x196   : > { %1166 = vmatpush.bf16.msra.mxu1 %v2858_v28  ;;  %v2806_v51 = vor.u32 %v3128_v48, %v2805_v47  ;;  %v2873_v52 = vld [vmem:[%s3723_s25 + $0xb0] sm:$0xf]  ;;  %v3144_v53 = vld [vmem:[%s3723_s25 + $0xb8] sm:$0xf0]  ;;  %v2861_v54 = vld [vmem:[%s3723_s25 + $0x98] sm:$0xf]  ;;  %v2810_v55 = vor.u32 %v3127_v49, %v2807_v50 }
 0x197   : > { %v2793_v56 = vld [vmem:[%s3723_s25 + $0x18] sm:$0xf]  ;;  %v3125_v57 = vld [vmem:[%s3723_s25 + $0x20] sm:$0xf0]  ;;  %v2874_v58 = vor.u32 %v3144_v53, %v2873_v52  ;;  %v3124_v60 = vld [vmem:[%s3723_s25 + $0x1c] sm:$0xf] }
 0x198   : > { %v3141_v59 = vld [vmem:[%s3723_s25 + $0xa0] sm:$0xf0]  ;;  %v2795_v61 = vld [vmem:[%s3723_s25 + $0x24] sm:$0xf0]  ;;  %v2794_v63 = vor.u32 %v3125_v57, %v2793_v56  ;;  %v2849_v0 = vld [vmem:[%s3723_s25 + $0x80] sm:$0xf] }
 0x199   : > { %1148 = vmatpush.bf16.msra.mxu0 %v2842_v33  ;;  %1184 = vmatpush.bf16.msra.mxu2 %v2874_v58  ;;  %v2862_v62 = vor.u32 %v3141_v59, %v2861_v54  ;;  %v3138_v1 = vld [vmem:[%s3723_s25 + $0x88] sm:$0xf0]  ;;  %v2798_v2 = vor.u32 %v3124_v60, %v2795_v61  ;;  %v2781_v3 = vld [vmem:[%s3723_s25] sm:$0xf]  ;;  %v3121_v5 = vld [vmem:[%s3723_s25 + $0x4] sm:$0xf] }
 0x19a   : > { %1167 = vmatpush.bf16.msra.mxu1 %v2846_v34  ;;  %v3122_v4 = vld [vmem:[%s3723_s25 + $0x8] sm:$0xf0]  ;;  %v2783_v6 = vld [vmem:[%s3723_s25 + $0xc] sm:$0xf0]  ;;  %v3851_v7 = vld [vmem:[#allocation2] sm:$0xff]  ;;  %v2850_v8 = vor.u32 %v3138_v1, %v2849_v0  ;;  %vm1219_vm13 = vcmask 523264  }
 0x19b   : > { %v2782_v9 = vor.u32 %v3122_v4, %v2781_v3  ;;  %v3853_v10 = vld [vmem:[#allocation2 + $0x8] sm:$0xff]  ;;  %v3135_v12 = vld [vmem:[%s3723_s25 + $0x70] sm:$0xf0]  ;;  %v2786_v13 = vor.u32 %v3121_v5, %v2783_v6  ;;  %v2825_v16 = vld [vmem:[%s3723_s25 + $0x50] sm:$0xf]  ;;  %vm1368_vm14 = vcmask 1043456  }
 0x19c   : > { %v2837_v11 = vld [vmem:[%s3723_s25 + $0x68] sm:$0xf]  ;;  %v976_v14 = vpack.c.bf16 %v3853_v10, %v3851_v7  ;;  %v3132_v17 = vld [vmem:[%s3723_s25 + $0x58] sm:$0xf0]  ;;  %v2813_v19 = vld [vmem:[%s3723_s25 + $0x38] sm:$0xf] }
 0x19d   : > { %1149 = vmatpush.bf16.msra.mxu0 %v2830_v40  ;;  %1185 = vmatpush.bf16.msra.mxu2 %v2862_v62  ;;  %v2838_v15 = vor.u32 %v3135_v12, %v2837_v11  ;;  %v2826_v18 = vor.u32 %v3132_v17, %v2825_v16  ;;  %v3129_v20 = vld [vmem:[%s3723_s25 + $0x40] sm:$0xf0]  ;;  %v2801_v22 = vld [vmem:[%s3723_s25 + $0x20] sm:$0xf]  ;;  %v3126_v23 = vld [vmem:[%s3723_s25 + $0x28] sm:$0xf0] }
 0x19e   : > { %1168 = vmatpush.bf16.msra.mxu1 %v2834_v44  ;;  %v2814_v21 = vor.u32 %v3129_v20, %v2813_v19  ;;  %v2802_v24 = vor.u32 %v3126_v23, %v2801_v22  ;;  %v2789_v25 = vld [vmem:[%s3723_s25 + $0x8] sm:$0xf]  ;;  %v3123_v26 = vld [vmem:[%s3723_s25 + $0x10] sm:$0xf0]  ;;  %v3869_v28 = vld [vmem:[#allocation2 + $0x18] sm:$0xff]  ;;  %s3498_s25 = smov 64  }
 0x19f   : > { %v3867_v27 = vld [vmem:[#allocation2 + $0x10] sm:$0xff]  ;;  %v2790_v29 = vor.u32 %v3123_v26, %v2789_v25  ;;  %v1010_v31 = vld [vmem:[%s3756_s27] sm:$0x7]  ;;  %s4332_s0 = sld [smem:[#allocation14_spill]]  ;;  %vm1316_vm15 = vcmask 64512   ;;  %s4335_s27 = scalar_lea.vmem %s4275_s9, %s3738_s20 }
 0x1a0   : > { %v977_v30 = vpack.c.bf16 %v3869_v28, %v3867_v27  ;;  %v1013_v32 = vperm.slane %v1010_v31, 1  ;;  %v1012_v34 = vperm.slane %v1010_v31, 0  ;;  %v1014_v4 = vperm.slane %v1010_v31, 2  ;;  %p3051_p10 = scmp.ne.s32.totalorder %s3624_s2, 1 }
 0x1a1   : > { %1150 = vmatpush.bf16.msra.mxu0 %v2818_v45  ;;  %1186 = vmatpush.bf16.msra.mxu2 %v2850_v8  ;;  %s4342_s30 = sld [smem:[#allocation25_spill]] (!%p3051_p10) }
 0x1a2   : > { %1169 = vmatpush.bf16.msra.mxu1 %v2822_v46  ;;  %s4343_s18 = sld [smem:[#allocation27_spill]] (!%p3051_p10) }
 0x1a3   : > { %s4344_s12 = sld [smem:[#allocation28_spill]] (!%p3051_p10) }
 0x1a5   : > { %1151 = vmatpush.bf16.msra.mxu0 %v2806_v51  ;;  %1187 = vmatpush.bf16.msra.mxu2 %v2838_v15 }
 0x1a6   : > { %1170 = vmatpush.bf16.msra.mxu1 %v2810_v55 }
 0x1a9   : > { %1152 = vmatpush.bf16.msra.mxu0 %v2794_v63  ;;  %1188 = vmatpush.bf16.msra.mxu2 %v2826_v18 }
 0x1aa   : > { %1171 = vmatpush.bf16.msra.mxu1 %v2798_v2 }
 0x1ad   : > { %1153 = vmatpush.bf16.msra.mxu0 %v2782_v9  ;;  %1189 = vmatpush.bf16.msra.mxu2 %v2814_v21  ;;  %v3915_v21 = vld [vmem:[%s4332_s0] ss:$0 sm:$0xff] }
 0x1ae   : > { %1172 = vmatpush.bf16.msra.mxu1 %v2786_v13 }
 0x1b0   : > { %1154 = vmatmul.bf16.vlgmr.msra.gmra.mxu0 %v976_v14 }
 0x1b1   : > { %1173 = vmatmul.bf16.vlgmr.msra.gmra.mxu1 %v976_v14  ;;  %1190 = vmatpush.bf16.msra.mxu2 %v2802_v24 }
 0x1b5   : > { %1191 = vmatpush.bf16.msra.mxu2 %v2790_v29  ;;  %v3922_v29 = vld [vmem:[%s4332_s0 + $0x1] ss:$0 sm:$0xff] }
 0x1b8   : > { %1192 = vmatmul.bf16.vlgmr.msra.gmra.mxu2 %v976_v14 }
 0x1c0   : > { %1159 = vmatmul.bf16.gmra.mxu0 %v977_v30 }
 0x1c1   : > { %1178 = vmatmul.bf16.gmra.mxu1 %v977_v30 }
 0x1c8   : > { %1197 = vmatmul.bf16.gmra.mxu2 %v977_v30 }
 0x22d   : > { %v1155_v37 = vpop.f32.mrf.mxu0 }
 0x22e   : > { %v1174_v33 = vpop.f32.mrf.mxu1  ;;  %v1156_v38 = vadd.f32 %v1155_v37, %v1012_v34 }
 0x22f   : > { %v1175_v35 = vadd.f32 %v1174_v33, %v1013_v32 }
 0x230   : > { %v3875_v43 = vpack.c.bf16 %v1156_v38, %v1156_v38 }
 0x231   : > { %v1211_v36 = vpack.c.bf16 %v1175_v35, %v1175_v35  ;;  %v3929_v35 = vld [vmem:[%s4332_s0 + $0x2] ss:$0 sm:$0xff] }
 0x233   : > { %v1224_v39 = vsel %vm1219_vm13, %v1211_v36, 0  ;;  %v1448_v40 = vunpack.c.l.b16 %v1211_v36 }
 0x234   : > { %1233 = vmatpush.bf16.xpose.msra.mxu3 %v1224_v39  ;;  %v1443_v39 = vunpack.c.l.b16 %v3875_v43 }
 0x235   : > { %v1449_v41 = vpack.c.b16 %v1448_v40, %v1448_v40  ;;  %v1157_v52 = vpop.f32.mrf.mxu0 }
 0x236   : > { %v1176_v42 = vpop.f32.mrf.mxu1  ;;  %v1158_v54 = vadd.f32 %v1157_v52, %v1012_v34 }
 0x237   : > { %v1177_v44 = vadd.f32 %v1176_v42, %v1013_v32  ;;  %1450 = vrot.lane.b32.xlu2 %v1449_v41, %s3498_s25  ;;  %v1444_v41 = vpack.c.b16 %v1443_v39, %v1443_v39 }
 0x238   : > { %v3886_v57 = vpack.c.bf16 %v1158_v54, %v1158_v54 }
 0x239   : > { %v1212_v45 = vpack.c.bf16 %v1177_v44, %v1177_v44  ;;  %v3938_v44 = vld [vmem:[%s4332_s0 + $0x3] ss:$0 sm:$0xff] }
 0x23b   : > { %2875 = vmatmul.msk.bf16.vlgmr.msra.gmra.mxu3 %vm1219_vm13, %v3875_v43  ;;  %v1243_v46 = vsel %vm1219_vm13, %v1212_v45, 0  ;;  %v1477_v47 = vunpack.c.l.b16 %v1212_v45  ;;  %v1193_v5 = vpop.f32.mrf.mxu2 }
 0x23c   : > { %1252 = vmatpush.bf16.xpose.msrb.mxu3 %v1243_v46  ;;  %v3900_v6 = vadd.f32 %v1193_v5, %v1014_v4 }
 0x23d   : > { %v1478_v48 = vpack.c.b16 %v1477_v47, %v1477_v47  ;;  %v1160_v62 = vpop.f32.mrf.mxu0 }
 0x23e   : > { %v1179_v49 = vpop.f32.mrf.mxu1  ;;  %v1161_v63 = vadd.f32 %v1160_v62, %v1012_v34 }
 0x23f   : > { %1479 = vrot.lane.b32.xlu0 %v1478_v48, %s3498_s25  ;;  %v1180_v50 = vadd.f32 %v1179_v49, %v1013_v32 }
 0x240   : > { %v3892_v0 = vpack.c.bf16 %v1161_v63, %v1161_v63 }
 0x241   : > { %v3882_v51 = vpack.c.bf16 %v1180_v50, %v1180_v50 }
 0x243   : > { %v1262_v53 = vsel %vm1219_vm13, %v3882_v51, 0  ;;  %v1195_v8 = vpop.f32.mrf.mxu2  ;;  %v1506_v49 = vunpack.c.l.b16 %v3882_v51 }
 0x244   : > { %1271 = vmatpush.bf16.xpose.msra.mxu3 %v1262_v53  ;;  %v3902_v9 = vadd.f32 %v1195_v8, %v1014_v4 }
 0x245   : > { %v1162_v1 = vpop.f32.mrf.mxu0  ;;  %v1507_v50 = vpack.c.b16 %v1506_v49, %v1506_v49 }
 0x246   : > { %v1181_v55 = vpop.f32.mrf.mxu1  ;;  %v1163_v2 = vadd.f32 %v1162_v1, %v1012_v34 }
 0x247   : > { %v1182_v56 = vadd.f32 %v1181_v55, %v1013_v32 }
 0x248   : > { %v3896_v3 = vpack.c.bf16 %v1163_v2, %v1163_v2 }
 0x249   : > { %v1214_v58 = vpack.c.bf16 %v1182_v56, %v1182_v56 }
 0x24b   : > { %2876 = vmatmul.msk.bf16.vlgmr.msrb.gmra.mxu3 %vm1219_vm13, %v3886_v57  ;;  %v1281_v59 = vsel %vm1219_vm13, %v1214_v58, 0  ;;  %v1535_v60 = vunpack.c.l.b16 %v1214_v58  ;;  %v1198_v11 = vpop.f32.mrf.mxu2 }
 0x24c   : > { %1290 = vmatpush.bf16.xpose.msrb.mxu3 %v1281_v59  ;;  %v3904_v12 = vadd.f32 %v1198_v11, %v1014_v4 }
 0x24d   : > { %v1536_v61 = vpack.c.b16 %v1535_v60, %v1535_v60 }
 0x24e   : > { %v3948_v5 = vpack.c.bf16 %v3904_v12, %v3904_v12 }
 0x24f   : > { %1537 = vrot.lane.b32.xlu2 %v1536_v61, %s3498_s25 }
 0x250   : > { %v1408_v8 = vsel %vm1368_vm14, %v3948_v5, 0 }
 0x251   : > { %1417 = vmatpush.bf16.msrb.mxu2 %v1408_v8 }
 0x253   : > { %v1200_v13 = vpop.f32.mrf.mxu2 }
 0x254   : > { %v1201_v14 = vadd.f32 %v1200_v13, %v1014_v4 }
 0x256   : > { %v3906_v15 = vpack.c.bf16 %v1201_v14, %v1201_v14  ;;  %v1472_v14 = vunpack.c.l.b16 %v3886_v57  ;;  %v1501_v57 = vunpack.c.l.b16 %v3892_v0 }
 0x258   : > { %v1427_v16 = vsel %vm1368_vm14, %v3906_v15, 0 }
 0x25b   : > { %2877 = vmatmul.msk.bf16.vlgmr.msra.gmra.mxu3 %vm1219_vm13, %v3892_v0 }
 0x25c   : > { %1436 = vmatpush.bf16.msra.mxu3 %v1427_v16 }
 0x26b   : > { %2878 = vmatmul.msk.bf16.vlgmr.msrb.gmra.mxu3 %vm1219_vm13, %v3896_v3 }
 0x291   : > { %v1451_v17 = vpop.permute.xlu2 %1450 }
 0x292   : > { %v1456_v18 = vsel %vm1219_vm13, %v1451_v17, 0 }
 0x293   : > { %1465 = vmatpush.bf16.xpose.msrb.mxu0 %v1456_v18  ;;  %v1473_v18 = vpack.c.b16 %v1472_v14, %v1472_v14 }
 0x2a9   : > { %v1538_v19 = vpop.permute.xlu2 %1537 }
 0x2aa   : > { %v1543_v20 = vsel %vm1219_vm13, %v1538_v19, 0 }
 0x2ab   : > { %1552 = vmatpush.bf16.xpose.msrb.mxu3 %v1543_v20  ;;  %v1530_v20 = vunpack.c.l.b16 %v3896_v3  ;;  %v3968_v3 = vpack.c.bf16 %v3900_v6, %v3900_v6 }
 0x2b1   : > { %v1480_v52 = vpop.permute.xlu0 %1479 }
 0x2be   : > { %v1235_v22 = vpop.f32.mrf.mxu3 }
 0x2bf   : > { %v1296_v23 = vmul.f32 0.125, %v1235_v22 }
 0x2c1   : > { %v1312_v24 = vadd.f32 %v3915_v21, %v1296_v23  ;;  %v1531_v23 = vpack.c.b16 %v1530_v20, %v1530_v20 }
 0x2c3   : > { %v1317_v25 = vsel %vm1316_vm15, %v1312_v24, -inf }
 0x2c4   : > { %1318 = vmax.xlane.f32.xlu0 %v1317_v25 }
 0x2c6   : > { %v1237_v26 = vpop.f32.mrf.mxu3 }
 0x2c7   : > { %v1502_v26 = vpack.c.b16 %v1501_v57, %v1501_v57 }
 0x2ce   : > { %v1254_v30 = vpop.f32.mrf.mxu3 }
 0x2cf   : > { %v1297_v31 = vmul.f32 0.125, %v1254_v30  ;;  %v3964_v30 = vpack.c.bf16 %v3902_v9, %v3902_v9  ;;  %v1485_v9 = vsel %vm1219_vm13, %v1480_v52, 0 }
 0x2d1   : > { %v1313_v32 = vadd.f32 %v3922_v29, %v1297_v31  ;;  %v1389_v31 = vsel %vm1368_vm14, %v3964_v30, 0 }
 0x2d3   : > { %v1320_v33 = vsel %vm1316_vm15, %v1313_v32, -inf }
 0x2d4   : > { %1321 = vmax.xlane.f32.xlu0 %v1320_v33 }
 0x2d6   : > { %v1256_v34 = vpop.f32.mrf.mxu3 }
 0x2de   : > { %v1273_v36 = vpop.f32.mrf.mxu3 }
 0x2df   : > { %v1298_v37 = vmul.f32 0.125, %v1273_v36 }
 0x2e1   : > { %v1314_v38 = vadd.f32 %v3929_v35, %v1298_v37 }
 0x2e3   : > { %v1323_v40 = vsel %vm1316_vm15, %v1314_v38, -inf }
 0x2e4   : > { %1324 = vmax.xlane.f32.xlu1 %v1323_v40 }
 0x2e6   : > { %v1275_v42 = vpop.f32.mrf.mxu3 }
 0x2e8   : > { %1445 = vrot.lane.b32.xlu0 %v1444_v41, %s3498_s25 }
 0x2ee   : > { %v1292_v45 = vpop.f32.mrf.mxu3 }
 0x2ef   : > { %v1299_v46 = vmul.f32 0.125, %v1292_v45 }
 0x2f1   : > { %v1315_v47 = vadd.f32 %v3938_v44, %v1299_v46 }
 0x2f3   : > { %v1326_v48 = vsel %vm1316_vm15, %v1315_v47, -inf }
 0x2f4   : > { %1327 = vmax.xlane.f32.xlu1 %v1326_v48 }
 0x2f6   : > { %v1294_v43 = vpop.f32.mrf.mxu3 }
 0x30d   : > { %1508 = vrot.lane.b32.xlu1 %v1507_v50, %s3498_s25 }
 0x337   : > { %v1319_v53 = vpop.xlane.xlu0 %1318 }
 0x338   : > { %v1329_v54 = vsub.f32 %v1312_v24, %v1319_v53 }
 0x33a   : > { %v1333_v55 = vmul.f32 1.442695, %v1329_v54 }
 0x33c   : > { %3293 = vpow2.f32 %v1333_v55 }
 0x342   : > { %v3294_v56 = vpop.eup %3293 }
 0x343   : > { %v1341_v58 = vsel %vm1316_vm15, %v3294_v56, 0.0 }
 0x344   : > { %1342 = vadd.xlane.f32.xlu2 %v1341_v58 }
 0x347   : > { %v1322_v59 = vpop.xlane.xlu0 %1321 }
 0x348   : > { %v1330_v60 = vsub.f32 %v1313_v32, %v1322_v59  ;;  %v1370_v32 = vsel %vm1368_vm14, %v3968_v3, 0 }
 0x349   : > { %1379 = vmatpush.bf16.msrb.mxu1 %v1370_v32 }
 0x34a   : > { %v1335_v61 = vmul.f32 1.442695, %v1330_v60 }
 0x34c   : > { %3295 = vpow2.f32 %v1335_v61 }
 0x34d   : > { %1398 = vmatpush.bf16.msra.mxu1 %v1389_v31 }
 0x352   : > { %v3296_v62 = vpop.eup %3295 }
 0x353   : > { %v1344_v63 = vsel %vm1316_vm15, %v3296_v62, 0.0 }
 0x354   : > { %1345 = vadd.xlane.f32.xlu2 %v1344_v63 }
 0x357   : > { %v1325_v51 = vpop.xlane.xlu1 %1324 }
 0x358   : > { %v1331_v1 = vsub.f32 %v1314_v38, %v1325_v51 }
 0x35a   : > { %v1337_v2 = vmul.f32 1.442695, %v1331_v1  ;;  %v1446_v4 = vpop.permute.xlu0 %1445 }
 0x35b   : > { %2883 = vmatmul.msk.bf16.vlgmr.msrb.gmra.mxu0 %vm1219_vm13, %v1446_v4 }
 0x35c   : > { %3297 = vpow2.f32 %v1337_v2 }
 0x362   : > { %v3298_v11 = vpop.eup %3297 }
 0x363   : > { %v1347_v13 = vsel %vm1316_vm15, %v3298_v11, 0.0 }
 0x364   : > { %1348 = vadd.xlane.f32.xlu0 %v1347_v13 }
 0x367   : > { %v1328_v16 = vpop.xlane.xlu1 %1327 }
 0x368   : > { %v1332_v17 = vsub.f32 %v1315_v47, %v1328_v16 }
 0x36a   : > { %v1339_v19 = vmul.f32 1.442695, %v1332_v17 }
 0x36c   : > { %3299 = vpow2.f32 %v1339_v19  ;;  %1474 = vrot.lane.b32.xlu2 %v1473_v18, %s3498_s25 }
 0x372   : > { %v3300_v12 = vpop.eup %3299 }
 0x373   : > { %v1350_v22 = vsel %vm1316_vm15, %v3300_v12, 0.0 }
 0x374   : > { %1351 = vadd.xlane.f32.xlu1 %v1350_v22 }
 0x378   : > { %1532 = vrot.lane.b32.xlu0 %v1531_v23, %s3498_s25 }
 0x37f   : > { %v1509_v24 = vpop.permute.xlu1 %1508 }
 0x380   : > { %v1514_v25 = vsel %vm1219_vm13, %v1509_v24, 0 }
 0x381   : > { %1523 = vmatpush.bf16.xpose.msra.mxu2 %v1514_v25 }
 0x38d   : > { %1503 = vrot.lane.b32.xlu1 %v1502_v26, %s3498_s25 }
 0x3b7   : > { %v1343_v0 = vpop.xlane.xlu2 %1342 }
 0x3b8   : > { %3301 = vrcp.f32 %v1343_v0 }
 0x3be   : > { %v3302_v33 = vpop.eup %3301 }
 0x3bf   : > { %v1357_v34 = vmul.f32 %v3302_v33, %v3294_v56 }
 0x3c1   : > { %v1361_v36 = vpack.c.bf16 %v1357_v34, %v1357_v34 }
 0x3c3   : > { %2879 = vmatmul.msk.bf16.vlgmr.msrb.gmra.mxu1 %vm1316_vm15, %v1361_v36 }
 0x3c4   : > { %1494 = vmatpush.bf16.xpose.msrb.mxu1 %v1485_v9 }
 0x3c7   : > { %v1346_v6 = vpop.xlane.xlu2 %1345 }
 0x3c8   : > { %3303 = vrcp.f32 %v1346_v6 }
 0x3ce   : > { %v3304_v37 = vpop.eup %3303 }
 0x3cf   : > { %v1358_v38 = vmul.f32 %v3304_v37, %v3296_v62  ;;  %v1475_v50 = vpop.permute.xlu2 %1474 }
 0x3d1   : > { %v1362_v39 = vpack.c.bf16 %v1358_v38, %v1358_v38 }
 0x3d3   : > { %2880 = vmatmul.msk.bf16.vlgmr.msra.gmra.mxu1 %vm1316_vm15, %v1362_v39 }
 0x3d7   : > { %v1349_v40 = vpop.xlane.xlu0 %1348 }
 0x3d8   : > { %3305 = vrcp.f32 %v1349_v40  ;;  %v1467_v41 = vpop.f32.mrf.mxu0 }
 0x3d9   : > { %v1558_v42 = vmul.f32 0.125, %v1467_v41 }
 0x3db   : > { %v1562_v45 = vadd.f32 %v3915_v21, %v1558_v42 }
 0x3dd   : > { %v1566_v46 = vsel %vm1316_vm15, %v1562_v45, -inf }
 0x3de   : > { %v3306_v47 = vpop.eup %3305  ;;  %1567 = vmax.xlane.f32.xlu2 %v1566_v46 }
 0x3df   : > { %v1359_v48 = vmul.f32 %v3306_v47, %v3298_v11 }
 0x3e0   : > { %v1469_v43 = vpop.f32.mrf.mxu0 }
 0x3e1   : > { %v1363_v49 = vpack.c.bf16 %v1359_v48, %v1359_v48 }
 0x3e3   : > { %2881 = vmatmul.msk.bf16.vlgmr.msrb.gmra.mxu2 %vm1316_vm15, %v1363_v49  ;;  %2884 = vmatmul.msk.bf16.vlgmr.msrb.gmra.mxu1 %vm1219_vm13, %v1475_v50 }
 0x3e7   : > { %v1352_v52 = vpop.xlane.xlu1 %1351 }
 0x3e8   : > { %3307 = vrcp.f32 %v1352_v52 }
 0x3ea   : > { %v1533_v56 = vpop.permute.xlu0 %1532 }
 0x3ee   : > { %v3308_v53 = vpop.eup %3307 }
 0x3ef   : > { %v1360_v54 = vmul.f32 %v3308_v53, %v3300_v12  ;;  %v1639_v12 = vunpack.c.l.b16 %v3964_v30  ;;  %v1615_v30 = vunpack.c.l.b16 %v3968_v3 }
 0x3f1   : > { %v1364_v55 = vpack.c.bf16 %v1360_v54, %v1360_v54  ;;  %v1616_v33 = vpack.c.b16 %v1615_v30, %v1615_v30  ;;  %v3147_v30 = vld [vmem:[%s3730_s1 + $0x10] sm:$0xff] }
 0x3f3   : > { %2882 = vmatmul.msk.bf16.vlgmr.msra.gmra.mxu3 %vm1316_vm15, %v1364_v55 }
 0x3ff   : > { %v1504_v21 = vpop.permute.xlu1 %1503 }
 0x400   : > { %2885 = vmatmul.msk.bf16.vlgmr.msra.gmra.mxu2 %vm1219_vm13, %v1504_v21 }
 0x403   : > { %2886 = vmatmul.msk.bf16.vlgmr.msrb.gmra.mxu3 %vm1219_vm13, %v1533_v56 }
 0x440   : > { %v3984_v58 = vpop.f32.mrf.mxu1 }
 0x448   : > { %v1383_v59 = vpop.f32.mrf.mxu1 }
 0x449   : > { %v1663_v59 = vunpack.c.l.b16 %v3948_v5 }
 0x450   : > { %v3986_v60 = vpop.f32.mrf.mxu1 }
 0x451   : > { %v1568_v62 = vpop.xlane.xlu2 %1567 }
 0x452   : > { %v1578_v63 = vsub.f32 %v1562_v45, %v1568_v62 }
 0x454   : > { %v1582_v51 = vmul.f32 1.442695, %v1578_v63 }
 0x456   : > { %3309 = vpow2.f32 %v1582_v51 }
 0x458   : > { %v1402_v61 = vpop.f32.mrf.mxu1 }
 0x459   : > { %v1664_v61 = vpack.c.b16 %v1663_v59, %v1663_v59 }
 0x45c   : > { %v3310_v14 = vpop.eup %3309 }
 0x45d   : > { %v1590_v16 = vsel %vm1316_vm15, %v3310_v14, 0.0 }
 0x460   : > { %v1496_v1 = vpop.f32.mrf.mxu1 }
 0x461   : > { %v1559_v2 = vmul.f32 0.125, %v1496_v1 }
 0x463   : > { %v1563_v4 = vadd.f32 %v3922_v29, %v1559_v2  ;;  %v1640_v29 = vpack.c.b16 %v1639_v12, %v1639_v12 }
 0x465   : > { %v1569_v8 = vsel %vm1316_vm15, %v1563_v4, -inf }
 0x466   : > { %v3990_v11 = vpop.f32.mrf.mxu2  ;;  %1570 = vmax.xlane.f32.xlu1 %v1569_v8 }
 0x468   : > { %v1498_v13 = vpop.f32.mrf.mxu1 }
 0x46e   : > { %v1421_v17 = vpop.f32.mrf.mxu2  ;;  %1591 = vadd.xlane.f32.xlu1 %v1590_v16 }
 0x476   : > { %v3993_v18 = vpop.f32.mrf.mxu3 }
 0x47e   : > { %v1440_v19 = vpop.f32.mrf.mxu3 }
 0x483   : > { %v1525_v20 = vpop.f32.mrf.mxu2 }
 0x484   : > { %v1560_v22 = vmul.f32 0.125, %v1525_v20 }
 0x486   : > { %v1554_v23 = vpop.f32.mrf.mxu3  ;;  %v1564_v24 = vadd.f32 %v3929_v35, %v1560_v22  ;;  %v1687_v35 = vunpack.c.l.b16 %v3906_v15 }
 0x487   : > { %v1561_v25 = vmul.f32 0.125, %v1554_v23  ;;  %1641 = vrot.lane.b32.xlu1 %v1640_v29, %s3498_s25 }
 0x488   : > { %v1572_v57 = vsel %vm1316_vm15, %v1564_v24, -inf  ;;  %v1688_v34 = vpack.c.b16 %v1687_v35, %v1687_v35  ;;  %v3146_v35 = vld [vmem:[%s3730_s1 + $0x8] sm:$0xff] }
 0x489   : > { %1573 = vmax.xlane.f32.xlu0 %v1572_v57  ;;  %v1565_v26 = vadd.f32 %v3938_v44, %v1561_v25  ;;  %v3152_v25 = vld [vmem:[%s3730_s1 + $0x38] sm:$0xff]  ;;  %v3151_v57 = vld [vmem:[%s3730_s1 + $0x30] sm:$0xff] }
 0x48b   : > { %v1527_v31 = vpop.f32.mrf.mxu2  ;;  %v1575_v32 = vsel %vm1316_vm15, %v1565_v26, -inf }
 0x48c   : > { %1576 = vmax.xlane.f32.xlu2 %v1575_v32  ;;  %v3149_v31 = vld [vmem:[%s3730_s1 + $0x20] sm:$0xff] }
 0x48e   : > { %v1556_v0 = vpop.f32.mrf.mxu3 }
 0x48f   : > { %v3148_v0 = vld [vmem:[%s3730_s1 + $0x18] sm:$0xff] }
 0x4a4   : > { %1617 = vrot.lane.b32.xlu2 %v1616_v33, %s3498_s25 }
 0x4ac   : > { %1689 = vrot.lane.b32.xlu2 %v1688_v34, %s3498_s25 }
 0x4d9   : > { %v1571_v36 = vpop.xlane.xlu1 %1570 }
 0x4da   : > { %v1579_v9 = vsub.f32 %v1563_v4, %v1571_v36 }
 0x4dc   : > { %v1584_v6 = vmul.f32 1.442695, %v1579_v9 }
 0x4de   : > { %3311 = vpow2.f32 %v1584_v6  ;;  %v3145_v6 = vld [vmem:[%s3730_s1] sm:$0xff] }
 0x4e1   : > { %v1592_v38 = vpop.xlane.xlu1 %1591 }
 0x4e2   : > { %3313 = vrcp.f32 %v1592_v38 }
 0x4e4   : > { %v3312_v44 = vpop.eup %3311 }
 0x4e5   : > { %v1593_v37 = vsel %vm1316_vm15, %v3312_v44, 0.0 }
 0x4e6   : > { %1594 = vadd.xlane.f32.xlu0 %v1593_v37 }
 0x4e8   : > { %v3314_v46 = vpop.eup %3313 }
 0x4e9   : > { %v1606_v48 = vmul.f32 %v3314_v46, %v3310_v14 }
 0x4eb   : > { %v1610_v53 = vpack.c.bf16 %v1606_v48, %v1606_v48 }
 0x4f9   : > { %v1642_v39 = vpop.permute.xlu1 %1641 }
 0x4fa   : > { %v1647_v3 = vsel %vm1368_vm14, %v1642_v39, 0 }
 0x4fb   : > { %1656 = vmatpush.bf16.msra.mxu1 %v1647_v3 }
 0x4fc   : > { %v1574_v40 = vpop.xlane.xlu0 %1573 }
 0x4fd   : > { %v1580_v41 = vsub.f32 %v1564_v24, %v1574_v40 }
 0x4ff   : > { %v1586_v15 = vmul.f32 1.442695, %v1580_v41  ;;  %v1577_v42 = vpop.xlane.xlu2 %1576 }
 0x500   : > { %v1581_v45 = vsub.f32 %v1565_v26, %v1577_v42  ;;  %v3150_v26 = vld [vmem:[%s3730_s1 + $0x28] sm:$0xff] }
 0x501   : > { %3315 = vpow2.f32 %v1586_v15 }
 0x502   : > { %v1588_v47 = vmul.f32 1.442695, %v1581_v45 }
 0x504   : > { %3317 = vpow2.f32 %v1588_v47 }
 0x507   : > { %v3316_v43 = vpop.eup %3315  ;;  %v1618_v49 = vpop.permute.xlu2 %1617 }
 0x508   : > { %v1623_v50 = vsel %vm1368_vm14, %v1618_v49, 0  ;;  %v1596_v52 = vsel %vm1316_vm15, %v3316_v43, 0.0 }
 0x509   : > { %1597 = vadd.xlane.f32.xlu0 %v1596_v52  ;;  %1632 = vmatpush.bf16.msra.mxu0 %v1623_v50 }
 0x50a   : > { %v3318_v54 = vpop.eup %3317 }
 0x50b   : > { %v1599_v56 = vsel %vm1316_vm15, %v3318_v54, 0.0 }
 0x50c   : > { %2887 = vmatmul.msk.bf16.vlgmr.msra.gmra.mxu0 %vm1316_vm15, %v1610_v53 }
 0x50d   : > { %1800 = vmatpush.bf16.msrb.mxu0 %v3152_v25 }
 0x50f   : > { %v1690_v55 = vpop.permute.xlu2 %1689 }
 0x510   : > { %v1695_v21 = vsel %vm1368_vm14, %v1690_v55, 0 }
 0x511   : > { %1600 = vadd.xlane.f32.xlu0 %v1599_v56  ;;  %1704 = vmatpush.bf16.msra.mxu3 %v1695_v21  ;;  %v3499_v56 = vmov 128.0  }
 0x512   : > { %1801 = vmatpush.bf16.msrb.mxu0 %v3151_v57  ;;  %v2983_v57 = vld [vmem:[%s3762_s23 + $0x78] sm:$0xf0] }
 0x516   : > { %1802 = vmatpush.bf16.msrb.mxu0 %v3150_v26 }
 0x51a   : > { %1803 = vmatpush.bf16.msrb.mxu0 %v3149_v31  ;;  %v2973_v31 = vld [vmem:[%s3762_s23 + $0x60] sm:$0xf] }
 0x51e   : > { %1804 = vmatpush.bf16.msrb.mxu0 %v3148_v0  ;;  %v3165_v0 = vld [vmem:[%s3762_s23 + $0x64] sm:$0xf] }
 0x522   : > { %1805 = vmatpush.bf16.msrb.mxu0 %v3147_v30 }
 0x525   : > { %1665 = vrot.lane.b32.xlu0 %v1664_v61, %s3498_s25 }
 0x526   : > { %1806 = vmatpush.bf16.msrb.mxu0 %v3146_v35 }
 0x52a   : > { %1807 = vmatpush.bf16.msrb.mxu0 %v3145_v6 }
 0x559   : > { %v1595_v62 = vpop.xlane.xlu0 %1594 }
 0x55a   : > { %3319 = vrcp.f32 %v1595_v62 }
 0x560   : > { %v3320_v63 = vpop.eup %3319 }
 0x561   : > { %v1607_v51 = vmul.f32 %v3320_v63, %v3312_v44 }
 0x563   : > { %v1611_v1 = vpack.c.bf16 %v1607_v51, %v1607_v51 }
 0x565   : > { %2888 = vmatmul.msk.bf16.vlgmr.msra.gmra.mxu1 %vm1316_vm15, %v1611_v1 }
 0x57c   : > { %v1598_v2 = vpop.xlane.xlu0 %1597 }
 0x584   : > { %v1601_v4 = vpop.xlane.xlu0 %1600 }
 0x585   : > { %3321 = vrcp.f32 %v1601_v4 }
 0x586   : > { %3323 = vrcp.f32 %v1598_v2 }
 0x587   : > { %3325 = vrcp.f32 %v3499_v56  ;;  %v2925_v56 = vld [vmem:[%s3762_s23] sm:$0xf] }
 0x589   : > { %v1634_v8 = vpop.f32.mrf.mxu0 }
 0x58b   : > { %v3322_v13 = vpop.eup %3321 }
 0x58c   : > { %v1609_v14 = vmul.f32 %v3322_v13, %v3318_v54  ;;  %v3324_v17 = vpop.eup %3323 }
 0x58d   : > { %v1608_v19 = vmul.f32 %v3324_v17, %v3316_v43  ;;  %v3326_v59 = vpop.eup %3325 }
 0x58e   : > { %v1613_v16 = vpack.c.bf16 %v1609_v14, %v1609_v14  ;;  %vm1838_vm0 = vweird.f32 %v3326_v59 }
 0x58f   : > { %v1612_v22 = vpack.c.bf16 %v1608_v19, %v1608_v19 }
 0x590   : > { %2890 = vmatmul.msk.bf16.vlgmr.msra.gmra.mxu3 %vm1316_vm15, %v1613_v16 }
 0x591   : > { %v1636_v5 = vpop.f32.mrf.mxu0 }
 0x597   : > { %v1666_v12 = vpop.permute.xlu0 %1665 }
 0x598   : > { %v1671_v20 = vsel %vm1368_vm14, %v1666_v12, 0 }
 0x599   : > { %1680 = vmatpush.bf16.msrb.mxu2 %v1671_v20 }
 0x59c   : > { %2889 = vmatmul.msk.bf16.vlgmr.msrb.gmra.mxu2 %vm1316_vm15, %v1612_v22 }
 0x5e2   : > { %v1658_v29 = vpop.f32.mrf.mxu1 }
 0x5e3   : > { %v3273_v23 = vpack.i.bf16 %v1658_v29, %v1634_v8  ;;  %v2981_v29 = vld [vmem:[%s3762_s23 + $0x70] sm:$0xf] }
 0x5e5   : > { %3274 = vrot.lane.b32.xlu1 %v3273_v23, %s3498_s25  ;;  %v3168_v23 = vld [vmem:[%s3762_s23 + $0x74] sm:$0xf0] }
 0x5e6   : > { %v2982_v25 = vor.u32 %v3168_v23, %v2981_v29 }
 0x5e8   : > { %2030 = vmatpush.bf16.msrb.mxu1 %v2982_v25 }
 0x5ea   : > { %v1660_v24 = vpop.f32.mrf.mxu1 }
 0x5eb   : > { %v3167_v24 = vld [vmem:[%s3762_s23 + $0x74] sm:$0xf] }
 0x5ec   : > { %v2986_v26 = vor.u32 %v3167_v24, %v2983_v57 }
 0x5ee   : > { %2049 = vmatpush.bf16.msra.mxu2 %v2986_v26 }
 0x613   : > { %v1706_v32 = vpop.f32.mrf.mxu3 }
 0x61b   : > { %v1708_v33 = vpop.f32.mrf.mxu3 }
 0x61c   : > { %v2975_v33 = vld [vmem:[%s3762_s23 + $0x68] sm:$0xf0] }
 0x61d   : > { %v2978_v35 = vor.u32 %v3165_v0, %v2975_v33  ;;  %v3288_v0 = vld [vmem:[%s4334_s14] ss:$0 sm:$0xff] }
 0x61f   : > { %v1682_v34 = vpop.f32.mrf.mxu2  ;;  %2050 = vmatpush.bf16.msra.mxu2 %v2978_v35 }
 0x620   : > { %v3278_v36 = vpack.i.bf16 %v1706_v32, %v1682_v34  ;;  %v3166_v32 = vld [vmem:[%s3762_s23 + $0x64] sm:$0xf0]  ;;  %v2965_v34 = vld [vmem:[%s3762_s23 + $0x50] sm:$0xf] }
 0x621   : > { %v2974_v30 = vor.u32 %v3166_v32, %v2973_v31 }
 0x622   : > { %3279 = vrot.lane.b32.xlu2 %v3278_v36, %s3498_s25  ;;  %v3164_v36 = vld [vmem:[%s3762_s23 + $0x54] sm:$0xf0] }
 0x623   : > { %2031 = vmatpush.bf16.msrb.mxu1 %v2974_v30  ;;  %v2966_v6 = vor.u32 %v3164_v36, %v2965_v34  ;;  %v3289_v36 = vld [vmem:[%s4335_s27] ss:$0 sm:$0xff] }
 0x627   : > { %v1684_v9 = vpop.f32.mrf.mxu2  ;;  %2032 = vmatpush.bf16.msrb.mxu1 %v2966_v6 }
 0x628   : > { %v3163_v9 = vld [vmem:[%s3762_s23 + $0x54] sm:$0xf] }
 0x657   : > { %v3275_v44 = vpop.permute.xlu1 %3274 }
 0x658   : > { %v3277_v37 = vunpack.i.h.bf16 %v3275_v44  ;;  %v3276_v38 = vunpack.i.l.bf16 %v3275_v44  ;;  %v2967_v44 = vld [vmem:[%s3762_s23 + $0x58] sm:$0xf0] }
 0x65a   : > { %v1727_v39 = vsel %vm1219_vm13, %v3986_v60, %v3277_v37  ;;  %v1726_v3 = vsel %vm1219_vm13, %v3984_v58, %v3276_v38  ;;  %v3287_v60 = vld [vmem:[%s4333_s4] ss:$0 sm:$0xff]  ;;  %v2970_v37 = vor.u32 %v3163_v9, %v2967_v44 }
 0x65b   : > { %v1730_v40 = vpack.c.bf16 %v1727_v39, %v1726_v3  ;;  %v2957_v38 = vld [vmem:[%s3762_s23 + $0x40] sm:$0xf]  ;;  %v3162_v39 = vld [vmem:[%s3762_s23 + $0x44] sm:$0xf0]  ;;  %v3161_v3 = vld [vmem:[%s3762_s23 + $0x44] sm:$0xf] }
 0x65c   : > { %2051 = vmatpush.bf16.msra.mxu2 %v2970_v37 }
 0x65d   : > { %1808 = vmatmul.bf16.vlgmr.msrb.gmra.mxu0 %v1730_v40  ;;  %v2958_v40 = vor.u32 %v3162_v39, %v2957_v38 }
 0x65f   : > { %2033 = vmatpush.bf16.msrb.mxu1 %v2958_v40 }
 0x67c   : > { %v3280_v41 = vpop.permute.xlu2 %3279 }
 0x67d   : > { %v3282_v15 = vunpack.i.h.bf16 %v3280_v41  ;;  %v3281_v42 = vunpack.i.l.bf16 %v3280_v41  ;;  %v2959_v41 = vld [vmem:[%s3762_s23 + $0x48] sm:$0xf0] }
 0x67f   : > { %v1728_v45 = vsel %vm1219_vm13, %v3990_v11, %v3281_v42  ;;  %v1729_v46 = vsel %vm1219_vm13, %v3993_v18, %v3282_v15  ;;  %v2962_v15 = vor.u32 %v3161_v3, %v2959_v41  ;;  %v2949_v42 = vld [vmem:[%s3762_s23 + $0x30] sm:$0xf] }
 0x680   : > { %v1731_v47 = vpack.c.bf16 %v1729_v46, %v1728_v45  ;;  %v3160_v45 = vld [vmem:[%s3762_s23 + $0x34] sm:$0xf0]  ;;  %v3159_v46 = vld [vmem:[%s3762_s23 + $0x34] sm:$0xf] }
 0x681   : > { %2052 = vmatpush.bf16.msra.mxu2 %v2962_v15 }
 0x682   : > { %1813 = vmatmul.bf16.gmra.mxu0 %v1731_v47  ;;  %v2950_v47 = vor.u32 %v3160_v45, %v2949_v42 }
 0x684   : > { %2034 = vmatpush.bf16.msrb.mxu1 %v2950_v47 }
 0x6da   : > { %v1809_v48 = vpop.f32.mrf.mxu0 }
 0x6db   : > { %v1810_v58 = vadd.f32 %v3287_v60, %v1809_v48 }
 0x6dd   : > { %v1819_v43 = vadd.f32 %v1810_v58, %v3851_v7  ;;  %v1834_v7 = vmul.f32 128.0, %v3326_v59  ;;  %v2941_v58 = vld [vmem:[%s3762_s23 + $0x20] sm:$0xf] }
 0x6df   : > { %1825 = vadd.xlane.f32.xlu1 %v1819_v43  ;;  %v1835_v61 = vsub.f32 1.0, %v1834_v7 }
 0x6e1   : > { %v1836_v62 = vmul.f32 %v3326_v59, %v1835_v61 }
 0x6e2   : > { %v1811_v49 = vpop.f32.mrf.mxu0 }
 0x6e3   : > { %v1812_v50 = vadd.f32 %v3287_v60, %v1811_v49  ;;  %v1837_v63 = vadd.f32 %v3326_v59, %v1836_v62  ;;  %v3157_v49 = vld [vmem:[%s3762_s23 + $0x24] sm:$0xf] }
 0x6e4   : > { %v3153_v62 = vld [vmem:[%s3762_s23 + $0x4] sm:$0xf] }
 0x6e5   : > { %v1820_v52 = vadd.f32 %v1812_v50, %v3853_v10  ;;  %v4045_v10 = vsel %vm1838_vm0, %v3326_v59, %v1837_v63  ;;  %v3154_v59 = vld [vmem:[%s3762_s23 + $0x4] sm:$0xf0]  ;;  %v2927_v63 = vld [vmem:[%s3762_s23 + $0x8] sm:$0xf0] }
 0x6e7   : > { %1827 = vadd.xlane.f32.xlu2 %v1820_v52 }
 0x6ff   : > { %v1814_v11 = vpop.f32.mrf.mxu0 }
 0x700   : > { %v1815_v53 = vadd.f32 %v3287_v60, %v1814_v11 }
 0x702   : > { %v1821_v18 = vadd.f32 %v1815_v53, %v3867_v27  ;;  %v2933_v53 = vld [vmem:[%s3762_s23 + $0x10] sm:$0xf] }
 0x704   : > { %1829 = vadd.xlane.f32.xlu0 %v1821_v18 }
 0x707   : > { %v1816_v54 = vpop.f32.mrf.mxu0 }
 0x708   : > { %v1817_v55 = vadd.f32 %v3287_v60, %v1816_v54  ;;  %v2951_v60 = vld [vmem:[%s3762_s23 + $0x38] sm:$0xf0]  ;;  %v3155_v54 = vld [vmem:[%s3762_s23 + $0x14] sm:$0xf] }
 0x709   : > { %v2954_v48 = vor.u32 %v3159_v46, %v2951_v60 }
 0x70a   : > { %v1822_v21 = vadd.f32 %v1817_v55, %v3869_v28 }
 0x70b   : > { %2053 = vmatpush.bf16.msra.mxu2 %v2954_v48 }
 0x70c   : > { %1831 = vadd.xlane.f32.xlu1 %v1822_v21 }
 0x752   : > { %v1826_v51 = vpop.xlane.xlu1 %1825 }
 0x753   : > { %v1840_v1 = vmul.f32 %v4045_v10, %v1826_v51 }
 0x755   : > { %v4048_v27 = vsub.f32 %v1819_v43, %v1840_v1  ;;  %v3158_v43 = vld [vmem:[%s3762_s23 + $0x24] sm:$0xf0]  ;;  %v2926_v1 = vor.u32 %v3154_v59, %v2925_v56  ;;  %v3176_v59 = vld [vmem:[%s3782_s26 + $0x38] sm:$0xff] }
 0x756   : > { %v2942_v50 = vor.u32 %v3158_v43, %v2941_v58  ;;  %2276 = vmatpush.bf16.msrb.mxu3 %v3176_v59 }
 0x757   : > { %v1848_v2 = vmul.f32 %v4048_v27, %v4048_v27 }
 0x758   : > { %2035 = vmatpush.bf16.msrb.mxu1 %v2942_v50 }
 0x759   : > { %1852 = vadd.xlane.f32.xlu2 %v1848_v2  ;;  %v2930_v2 = vor.u32 %v3153_v62, %v2927_v63  ;;  %v3183_v62 = vld [vmem:[%s3782_s26 + $0x70] sm:$0xff]  ;;  %v3173_v63 = vld [vmem:[%s3782_s26 + $0x20] sm:$0xff] }
 0x75a   : > { %v1828_v28 = vpop.xlane.xlu2 %1827 }
 0x75b   : > { %v1841_v4 = vmul.f32 %v4045_v10, %v1828_v28 }
 0x75d   : > { %v4053_v8 = vsub.f32 %v1820_v52, %v1841_v4  ;;  %v2943_v52 = vld [vmem:[%s3762_s23 + $0x28] sm:$0xf0] }
 0x75e   : > { %v2946_v11 = vor.u32 %v3157_v49, %v2943_v52 }
 0x75f   : > { %v1849_v13 = vmul.f32 %v4053_v8, %v4053_v8 }
 0x760   : > { %2054 = vmatpush.bf16.msra.mxu2 %v2946_v11 }
 0x761   : > { %1854 = vadd.xlane.f32.xlu0 %v1849_v13 }
 0x777   : > { %v1830_v14 = vpop.xlane.xlu0 %1829 }
 0x778   : > { %v1842_v16 = vmul.f32 %v4045_v10, %v1830_v14 }
 0x77a   : > { %v4058_v5 = vsub.f32 %v1821_v18, %v1842_v16  ;;  %v3156_v18 = vld [vmem:[%s3762_s23 + $0x14] sm:$0xf0] }
 0x77b   : > { %v2934_v55 = vor.u32 %v3156_v18, %v2933_v53 }
 0x77c   : > { %v1850_v17 = vmul.f32 %v4058_v5, %v4058_v5 }
 0x77d   : > { %2036 = vmatpush.bf16.msrb.mxu1 %v2934_v55 }
 0x77e   : > { %1856 = vadd.xlane.f32.xlu1 %v1850_v17 }
 0x77f   : > { %v1832_v19 = vpop.xlane.xlu1 %1831 }
 0x780   : > { %v1843_v12 = vmul.f32 %v4045_v10, %v1832_v19 }
 0x781   : > { %2037 = vmatpush.bf16.msrb.mxu1 %v2926_v1  ;;  %v3172_v1 = vld [vmem:[%s3782_s26 + $0x18] sm:$0xff] }
 0x782   : > { %v4063_v20 = vsub.f32 %v1822_v21, %v1843_v12  ;;  %v2935_v21 = vld [vmem:[%s3762_s23 + $0x18] sm:$0xf0]  ;;  %s4340_s23 = sld [smem:[#allocation26_spill]] (!%p3051_p10) }
 0x783   : > { %v2938_v61 = vor.u32 %v3155_v54, %v2935_v21 }
 0x784   : > { %v1851_v22 = vmul.f32 %v4063_v20, %v4063_v20 }
 0x785   : > { %2055 = vmatpush.bf16.msra.mxu2 %v2938_v61  ;;  %v3174_v61 = vld [vmem:[%s3782_s26 + $0x28] sm:$0xff] }
 0x786   : > { %1858 = vadd.xlane.f32.xlu2 %v1851_v22 }
 0x788   : > { %s4341_s6 = smov (!%p3051_p10), %s4340_s23 }
 0x789   : > { %2056 = vmatpush.bf16.msra.mxu2 %v2930_v2  ;;  %v3181_v2 = vld [vmem:[%s3782_s26 + $0x60] sm:$0xff] }
 0x7cc   : > { %v1853_v7 = vpop.xlane.xlu2 %1852 }
 0x7cd   : > { %v1860_v51 = vmul.f32 %v1853_v7, %v4045_v10  ;;  %v3175_v7 = vld [vmem:[%s3782_s26 + $0x30] sm:$0xff] }
 0x7ce   : > { %2277 = vmatpush.bf16.msrb.mxu3 %v3175_v7 }
 0x7cf   : > { %v1864_v28 = vadd.f32 1e-12, %v1860_v51  ;;  %v3182_v51 = vld [vmem:[%s3782_s26 + $0x68] sm:$0xff] }
 0x7d1   : > { %3327 = vrsqrt.f32 %v1864_v28  ;;  %vm1874_vm2 = vweird.f32 %v1864_v28 }
 0x7d2   : > { %2278 = vmatpush.bf16.msrb.mxu3 %v3174_v61 }
 0x7d4   : > { %v1855_v4 = vpop.xlane.xlu0 %1854 }
 0x7d5   : > { %v1861_v13 = vmul.f32 %v1855_v4, %v4045_v10  ;;  %v3180_v4 = vld [vmem:[%s3782_s26 + $0x58] sm:$0xff] }
 0x7d6   : > { %2279 = vmatpush.bf16.msrb.mxu3 %v3173_v63 }
 0x7d7   : > { %v3328_v14 = vpop.eup %3327  ;;  %v1865_v16 = vadd.f32 1e-12, %v1861_v13  ;;  %v3170_v13 = vld [vmem:[%s3782_s26 + $0x8] sm:$0xff] }
 0x7d8   : > { %v1869_v17 = vmul.f32 %v3328_v14, %v1864_v28  ;;  %vm1875_vm1 = vweird.f32 %v3328_v14  ;;  %v3171_v28 = vld [vmem:[%s3782_s26 + $0x10] sm:$0xff] }
 0x7d9   : > { %3329 = vrsqrt.f32 %v1865_v16  ;;  %vm1876_vm3 = vmor %vm1874_vm2, %vm1875_vm1  ;;  %vm1884_vm5 = vweird.f32 %v1865_v16 }
 0x7da   : > { %v1870_v19 = vmul.f32 %v3328_v14, %v1869_v17  ;;  %2280 = vmatpush.bf16.msrb.mxu3 %v3172_v1  ;;  %v3169_v17 = vld [vmem:[%s3782_s26] sm:$0xff] }
 0x7dc   : > { %v1871_v12 = vmul.f32 0.5, %v1870_v19 }
 0x7de   : > { %v1872_v22 = vsub.f32 1.5, %v1871_v12  ;;  %2281 = vmatpush.bf16.msrb.mxu3 %v3171_v28  ;;  %v3178_v12 = vld [vmem:[%s3782_s26 + $0x48] sm:$0xff] }
 0x7df   : > { %v3330_v29 = vpop.eup %3329 }
 0x7e0   : > { %v1873_v23 = vmul.f32 %v3328_v14, %v1872_v22  ;;  %v1879_v24 = vmul.f32 %v3330_v29, %v1865_v16  ;;  %vm1885_vm4 = vweird.f32 %v3330_v29  ;;  %v3179_v16 = vld [vmem:[%s3782_s26 + $0x50] sm:$0xff] }
 0x7e1   : > { %vm1886_vm6 = vmor %vm1884_vm5, %vm1885_vm4 }
 0x7e2   : > { %v1880_v25 = vmul.f32 %v3330_v29, %v1879_v24  ;;  %v1877_v57 = vsel %vm1876_vm3, %v3328_v14, %v1873_v23  ;;  %v1944_v14 = vld [vmem:[%s3768_s15] sm:$0x3]  ;;  %2282 = vmatpush.bf16.msrb.mxu3 %v3170_v13 }
 0x7e3   : > { %v1908_v32 = vmul.f32 %v1877_v57, %v4048_v27  ;;  %v4144_v19 = vperm.slane %v1944_v14, 0  ;;  %v4148_v24 = vperm.slane %v1944_v14, 1 }
 0x7e4   : > { %v1881_v26 = vmul.f32 0.5, %v1880_v25  ;;  %v3177_v25 = vld [vmem:[%s3782_s26 + $0x40] sm:$0xff] }
 0x7e5   : > { %v1915_v34 = vmul.f32 %v3288_v0, %v1908_v32 }
 0x7e6   : > { %v1882_v31 = vsub.f32 1.5, %v1881_v26  ;;  %2283 = vmatpush.bf16.msrb.mxu3 %v3169_v17 }
 0x7e7   : > { %v4113_v6 = vadd.f32 %v3289_v36, %v1915_v34 }
 0x7e8   : > { %v1883_v30 = vmul.f32 %v3330_v29, %v1882_v31 }
 0x7ea   : > { %v1887_v33 = vsel %vm1886_vm6, %v3330_v29, %v1883_v30 }
 0x7eb   : > { %v1909_v35 = vmul.f32 %v1887_v33, %v4053_v8 }
 0x7ed   : > { %v1916_v9 = vmul.f32 %v3288_v0, %v1909_v35 }
 0x7ef   : > { %v4115_v27 = vadd.f32 %v3289_v36, %v1916_v9 }
 0x7f1   : > { %v1857_v44 = vpop.xlane.xlu1 %1856  ;;  %v1926_v37 = vpack.c.bf16 %v4115_v27, %v4113_v6 }
 0x7f2   : > { %v1862_v38 = vmul.f32 %v1857_v44, %v4045_v10 }
 0x7f3   : > { %2038 = vmatmul.bf16.vlgmr.msrb.gmra.mxu1 %v1926_v37  ;;  %2057 = vmatmul.bf16.vlgmr.msra.gmra.mxu2 %v1926_v37 }
 0x7f4   : > { %v1866_v8 = vadd.f32 1e-12, %v1862_v38 }
 0x7f6   : > { %3331 = vrsqrt.f32 %v1866_v8  ;;  %vm1894_vm8 = vweird.f32 %v1866_v8 }
 0x7f9   : > { %v1859_v39 = vpop.xlane.xlu2 %1858 }
 0x7fa   : > { %v1863_v3 = vmul.f32 %v1859_v39, %v4045_v10 }
 0x7fc   : > { %v3332_v40 = vpop.eup %3331  ;;  %v1867_v41 = vadd.f32 1e-12, %v1863_v3 }
 0x7fd   : > { %v1889_v15 = vmul.f32 %v3332_v40, %v1866_v8  ;;  %vm1895_vm7 = vweird.f32 %v3332_v40 }
 0x7fe   : > { %3333 = vrsqrt.f32 %v1867_v41  ;;  %vm1896_vm9 = vmor %vm1894_vm8, %vm1895_vm7  ;;  %vm1904_vm11 = vweird.f32 %v1867_v41 }
 0x7ff   : > { %v1890_v42 = vmul.f32 %v3332_v40, %v1889_v15 }
 0x801   : > { %v1891_v45 = vmul.f32 0.5, %v1890_v42 }
 0x803   : > { %v1892_v46 = vsub.f32 1.5, %v1891_v45 }
 0x804   : > { %v3334_v47 = vpop.eup %3333 }
 0x805   : > { %v1893_v60 = vmul.f32 %v3332_v40, %v1892_v46  ;;  %v1899_v48 = vmul.f32 %v3334_v47, %v1867_v41  ;;  %vm1905_vm10 = vweird.f32 %v3334_v47 }
 0x806   : > { %vm1906_vm12 = vmor %vm1904_vm11, %vm1905_vm10 }
 0x807   : > { %v1900_v58 = vmul.f32 %v3334_v47, %v1899_v48  ;;  %v1897_v49 = vsel %vm1896_vm9, %v3332_v40, %v1893_v60 }
 0x808   : > { %v1910_v52 = vmul.f32 %v1897_v49, %v4058_v5 }
 0x809   : > { %v1901_v43 = vmul.f32 0.5, %v1900_v58 }
 0x80a   : > { %v1917_v54 = vmul.f32 %v3288_v0, %v1910_v52 }
 0x80b   : > { %v1902_v50 = vsub.f32 1.5, %v1901_v43 }
 0x80c   : > { %v4123_v21 = vadd.f32 %v3289_v36, %v1917_v54 }
 0x80d   : > { %v1903_v11 = vmul.f32 %v3334_v47, %v1902_v50 }
 0x80f   : > { %v1907_v53 = vsel %vm1906_vm12, %v3334_v47, %v1903_v11 }
 0x810   : > { %v1911_v18 = vmul.f32 %v1907_v53, %v4063_v20  ;;  %v3184_v20 = vld [vmem:[%s3782_s26 + $0x78] sm:$0xff] }
 0x811   : > { %2295 = vmatpush.bf16.msra.mxu0 %v3184_v20 }
 0x812   : > { %v1918_v55 = vmul.f32 %v3288_v0, %v1911_v18 }
 0x814   : > { %v4125_v56 = vadd.f32 %v3289_v36, %v1918_v55 }
 0x815   : > { %2296 = vmatpush.bf16.msra.mxu0 %v3183_v62 }
 0x816   : > { %v1927_v5 = vpack.c.bf16 %v4125_v56, %v4123_v21 }
 0x818   : > { %2043 = vmatmul.bf16.gmra.mxu1 %v1927_v5  ;;  %2062 = vmatmul.bf16.gmra.mxu2 %v1927_v5 }
 0x819   : > { %2297 = vmatpush.bf16.msra.mxu0 %v3182_v51 }
 0x81d   : > { %2298 = vmatpush.bf16.msra.mxu0 %v3181_v2 }
 0x821   : > { %2299 = vmatpush.bf16.msra.mxu0 %v3180_v4 }
 0x825   : > { %2300 = vmatpush.bf16.msra.mxu0 %v3179_v16 }
 0x829   : > { %2301 = vmatpush.bf16.msra.mxu0 %v3178_v12 }
 0x82d   : > { %2302 = vmatpush.bf16.msra.mxu0 %v3177_v25 }
 0x870   : > { %v2039_v22 = vpop.f32.mrf.mxu1 }
 0x871   : > { %v2040_v29 = vadd.f32 %v2039_v22, %v4144_v19 }
 0x873   : > { %v2076_v23 = vmul.f32 0.044715, %v2040_v29  ;;  %v2068_v49 = vmul.f32 0.5, %v2040_v29 }
 0x875   : > { %v2084_v57 = vmul.f32 %v2076_v23, %v2040_v29 }
 0x876   : > { %v2058_v26 = vpop.f32.mrf.mxu2 }
 0x877   : > { %v2092_v31 = vmul.f32 %v2084_v57, %v2040_v29  ;;  %v2059_v32 = vadd.f32 %v2058_v26, %v4148_v24 }
 0x878   : > { %v2041_v0 = vpop.f32.mrf.mxu1 }
 0x879   : > { %v2100_v30 = vadd.f32 %v2092_v31, %v2040_v29  ;;  %v2077_v33 = vmul.f32 0.044715, %v2059_v32  ;;  %v2042_v35 = vadd.f32 %v2041_v0, %v4144_v19  ;;  %v2069_v59 = vmul.f32 0.5, %v2059_v32 }
 0x87b   : > { %v2085_v34 = vmul.f32 %v2077_v33, %v2059_v32  ;;  %v2078_v36 = vmul.f32 0.044715, %v2042_v35  ;;  %v2108_v9 = vmul.f32 0.7978846, %v2100_v30  ;;  %v2070_v50 = vmul.f32 0.5, %v2042_v35 }
 0x87d   : > { %v2093_v44 = vmul.f32 %v2085_v34, %v2059_v32  ;;  %v2086_v37 = vmul.f32 %v2078_v36, %v2042_v35  ;;  %3335 = vtanh.f32 %v2108_v9 }
 0x87e   : > { %v2060_v38 = vpop.f32.mrf.mxu2 }
 0x87f   : > { %v2101_v8 = vadd.f32 %v2093_v44, %v2059_v32  ;;  %v2094_v39 = vmul.f32 %v2086_v37, %v2042_v35  ;;  %v2061_v3 = vadd.f32 %v2060_v38, %v4148_v24 }
 0x881   : > { %v2102_v40 = vadd.f32 %v2094_v39, %v2042_v35  ;;  %v2079_v41 = vmul.f32 0.044715, %v2061_v3  ;;  %v2109_v15 = vmul.f32 0.7978846, %v2101_v8  ;;  %v2071_v7 = vmul.f32 0.5, %v2061_v3 }
 0x883   : > { %v2110_v42 = vmul.f32 0.7978846, %v2102_v40  ;;  %v2087_v45 = vmul.f32 %v2079_v41, %v2061_v3  ;;  %v3336_v47 = vpop.eup %3335 }
 0x884   : > { %v2124_v58 = vadd.f32 1.0, %v3336_v47 }
 0x885   : > { %v2095_v46 = vmul.f32 %v2087_v45, %v2061_v3  ;;  %3337 = vtanh.f32 %v2110_v42 }
 0x886   : > { %3339 = vtanh.f32 %v2109_v15  ;;  %v2132_v53 = vmul.f32 %v2124_v58, %v2068_v49 }
 0x887   : > { %v2103_v60 = vadd.f32 %v2095_v46, %v2061_v3 }
 0x889   : > { %v2111_v48 = vmul.f32 0.7978846, %v2103_v60 }
 0x88b   : > { %v3338_v43 = vpop.eup %3337  ;;  %3341 = vtanh.f32 %v2111_v48 }
 0x88c   : > { %v2126_v52 = vadd.f32 1.0, %v3338_v43  ;;  %v3340_v11 = vpop.eup %3339 }
 0x88d   : > { %v2125_v55 = vadd.f32 1.0, %v3340_v11 }
 0x88e   : > { %v2134_v18 = vmul.f32 %v2126_v52, %v2070_v50  ;;  %v3290_v52 = vld [vmem:[%s849_s13] ss:$0 sm:$0xff] }
 0x88f   : > { %v2133_v61 = vmul.f32 %v2125_v55, %v2069_v59 }
 0x890   : > { %v2140_v54 = vpack.c.bf16 %v2134_v18, %v2132_v53 }
 0x891   : > { %v3342_v5 = vpop.eup %3341 }
 0x892   : > { %2284 = vmatmul.bf16.vlgmr.msrb.gmra.mxu3 %v2140_v54  ;;  %v2127_v20 = vadd.f32 1.0, %v3342_v5 }
 0x894   : > { %v2135_v62 = vmul.f32 %v2127_v20, %v2071_v7 }
 0x895   : > { %v2044_v63 = vpop.f32.mrf.mxu1 }
 0x896   : > { %v2045_v51 = vadd.f32 %v2044_v63, %v4144_v19  ;;  %v2141_v1 = vpack.c.bf16 %v2135_v62, %v2133_v61 }
 0x898   : > { %v2080_v2 = vmul.f32 0.044715, %v2045_v51  ;;  %2303 = vmatmul.bf16.vlgmr.msra.gmra.mxu0 %v2141_v1  ;;  %v2072_v3 = vmul.f32 0.5, %v2045_v51 }
 0x89a   : > { %v2088_v28 = vmul.f32 %v2080_v2, %v2045_v51 }
 0x89b   : > { %v2063_v4 = vpop.f32.mrf.mxu2 }
 0x89c   : > { %v2064_v13 = vadd.f32 %v2063_v4, %v4148_v24  ;;  %v2096_v14 = vmul.f32 %v2088_v28, %v2045_v51 }
 0x89d   : > { %v2046_v16 = vpop.f32.mrf.mxu1 }
 0x89e   : > { %v2081_v17 = vmul.f32 0.044715, %v2064_v13  ;;  %v2047_v12 = vadd.f32 %v2046_v16, %v4144_v19  ;;  %v2104_v22 = vadd.f32 %v2096_v14, %v2045_v51  ;;  %v2073_v60 = vmul.f32 0.5, %v2064_v13 }
 0x8a0   : > { %v2082_v29 = vmul.f32 0.044715, %v2047_v12  ;;  %v2089_v23 = vmul.f32 %v2081_v17, %v2064_v13  ;;  %v2112_v57 = vmul.f32 0.7978846, %v2104_v22  ;;  %v2074_v40 = vmul.f32 0.5, %v2047_v12 }
 0x8a2   : > { %v2090_v25 = vmul.f32 %v2082_v29, %v2047_v12  ;;  %v2097_v26 = vmul.f32 %v2089_v23, %v2064_v13  ;;  %3343 = vtanh.f32 %v2112_v57 }
 0x8a3   : > { %v2065_v31 = vpop.f32.mrf.mxu2 }
 0x8a4   : > { %v2066_v32 = vadd.f32 %v2065_v31, %v4148_v24  ;;  %v2098_v0 = vmul.f32 %v2090_v25, %v2047_v12  ;;  %v2105_v30 = vadd.f32 %v2097_v26, %v2064_v13 }
 0x8a6   : > { %v2083_v33 = vmul.f32 0.044715, %v2066_v32  ;;  %v2106_v35 = vadd.f32 %v2098_v0, %v2047_v12  ;;  %v2113_v9 = vmul.f32 0.7978846, %v2105_v30  ;;  %v2075_v48 = vmul.f32 0.5, %v2066_v32 }
 0x8a8   : > { %v2114_v34 = vmul.f32 0.7978846, %v2106_v35  ;;  %v2091_v36 = vmul.f32 %v2083_v33, %v2066_v32  ;;  %v3344_v19 = vpop.eup %3343 }
 0x8a9   : > { %v2128_v8 = vadd.f32 1.0, %v3344_v19 }
 0x8aa   : > { %3345 = vtanh.f32 %v2114_v34  ;;  %v2099_v44 = vmul.f32 %v2091_v36, %v2066_v32 }
 0x8ab   : > { %3347 = vtanh.f32 %v2113_v9  ;;  %v2136_v15 = vmul.f32 %v2128_v8, %v2072_v3 }
 0x8ac   : > { %v2107_v37 = vadd.f32 %v2099_v44, %v2066_v32 }
 0x8ae   : > { %v2115_v38 = vmul.f32 0.7978846, %v2107_v37 }
 0x8b0   : > { %v3346_v39 = vpop.eup %3345  ;;  %3349 = vtanh.f32 %v2115_v38 }
 0x8b1   : > { %v2130_v24 = vadd.f32 1.0, %v3346_v39  ;;  %v3348_v41 = vpop.eup %3347 }
 0x8b2   : > { %v2129_v46 = vadd.f32 1.0, %v3348_v41  ;;  %v3291_v41 = vld [vmem:[%s852_s17] ss:$0 sm:$0xff] }
 0x8b3   : > { %v2138_v42 = vmul.f32 %v2130_v24, %v2074_v40 }
 0x8b4   : > { %v2137_v43 = vmul.f32 %v2129_v46, %v2073_v60 }
 0x8b5   : > { %v2142_v45 = vpack.c.bf16 %v2138_v42, %v2136_v15 }
 0x8b6   : > { %v3350_v47 = vpop.eup %3349 }
 0x8b7   : > { %2289 = vmatmul.bf16.gmra.mxu3 %v2142_v45  ;;  %v2131_v58 = vadd.f32 1.0, %v3350_v47  ;;  %v3292_v45 = vld [vmem:[%s855_s29] ss:$0 sm:$0xff]  ;;  %s4339_s29 = sld [smem:[#allocation24_spill]] (!%p3051_p10) }
 0x8b9   : > { %v2139_v49 = vmul.f32 %v2131_v58, %v2075_v48 }
 0x8bb   : > { %v2143_v50 = vpack.c.bf16 %v2139_v49, %v2137_v43 }
 0x8bd   : > { %2308 = vmatmul.bf16.gmra.mxu0 %v2143_v50 }
 0x915   : > { %v2285_v11 = vpop.f32.mrf.mxu3  ;;  %v2304_v53 = vpop.f32.mrf.mxu0 }
 0x916   : > { %v2286_v18 = vadd.f32 %v3290_v52, %v2285_v11 }
 0x918   : > { %v2305_v54 = vadd.f32 %v2304_v53, %v2286_v18 }
 0x91a   : > { %v2314_v55 = vadd.f32 %v2305_v54, %v4113_v6 }
 0x91c   : > { %2320 = vadd.xlane.f32.xlu0 %v2314_v55 }
 0x91d   : > { %v2287_v5 = vpop.f32.mrf.mxu3  ;;  %v2306_v7 = vpop.f32.mrf.mxu0 }
 0x91e   : > { %v2288_v59 = vadd.f32 %v3290_v52, %v2287_v5 }
 0x920   : > { %v2307_v20 = vadd.f32 %v2306_v7, %v2288_v59 }
 0x922   : > { %v2315_v61 = vadd.f32 %v2307_v20, %v4115_v27 }
 0x924   : > { %2322 = vadd.xlane.f32.xlu1 %v2315_v61 }
 0x93a   : > { %v2290_v62 = vpop.f32.mrf.mxu3  ;;  %v2309_v63 = vpop.f32.mrf.mxu0 }
 0x93b   : > { %v2291_v51 = vadd.f32 %v3290_v52, %v2290_v62 }
 0x93d   : > { %v2310_v1 = vadd.f32 %v2309_v63, %v2291_v51 }
 0x93f   : > { %v2316_v2 = vadd.f32 %v2310_v1, %v4123_v21 }
 0x941   : > { %2324 = vadd.xlane.f32.xlu2 %v2316_v2 }
 0x942   : > { %v2292_v28 = vpop.f32.mrf.mxu3  ;;  %v2311_v13 = vpop.f32.mrf.mxu0 }
 0x943   : > { %v2293_v4 = vadd.f32 %v3290_v52, %v2292_v28 }
 0x945   : > { %v2312_v14 = vadd.f32 %v2311_v13, %v2293_v4 }
 0x947   : > { %v2317_v6 = vadd.f32 %v2312_v14, %v4125_v56 }
 0x949   : > { %2326 = vadd.xlane.f32.xlu0 %v2317_v6 }
 0x98f   : > { %v2321_v16 = vpop.xlane.xlu0 %2320 }
 0x990   : > { %v2328_v17 = vmul.f32 %v2321_v16, %v4045_v10 }
 0x992   : > { %v2332_v12 = vsub.f32 %v2314_v55, %v2328_v17 }
 0x994   : > { %v2336_v27 = vmul.f32 %v2332_v12, %v2332_v12 }
 0x996   : > { %2340 = vadd.xlane.f32.xlu1 %v2336_v27 }
 0x997   : > { %v2323_v22 = vpop.xlane.xlu1 %2322 }
 0x998   : > { %v2329_v29 = vmul.f32 %v2323_v22, %v4045_v10 }
 0x99a   : > { %v2333_v23 = vsub.f32 %v2315_v61, %v2329_v29 }
 0x99c   : > { %v2337_v25 = vmul.f32 %v2333_v23, %v2333_v23 }
 0x99e   : > { %2342 = vadd.xlane.f32.xlu2 %v2337_v25 }
 0x9b4   : > { %v2325_v21 = vpop.xlane.xlu2 %2324 }
 0x9b5   : > { %v2330_v57 = vmul.f32 %v2325_v21, %v4045_v10 }
 0x9b7   : > { %v4170_v26 = vsub.f32 %v2316_v2, %v2330_v57 }
 0x9b9   : > { %v2338_v56 = vmul.f32 %v4170_v26, %v4170_v26 }
 0x9bb   : > { %2344 = vadd.xlane.f32.xlu0 %v2338_v56 }
 0x9bc   : > { %v2327_v31 = vpop.xlane.xlu0 %2326 }
 0x9bd   : > { %v2331_v32 = vmul.f32 %v2327_v31, %v4045_v10 }
 0x9bf   : > { %v4175_v0 = vsub.f32 %v2317_v6, %v2331_v32 }
 0x9c1   : > { %v2339_v30 = vmul.f32 %v4175_v0, %v4175_v0 }
 0x9c3   : > { %2346 = vadd.xlane.f32.xlu1 %v2339_v30 }
 0xa09   : > { %v2341_v33 = vpop.xlane.xlu1 %2340 }
 0xa0a   : > { %v2348_v35 = vmul.f32 %v2341_v33, %v4045_v10 }
 0xa0c   : > { %v2352_v34 = vadd.f32 1e-12, %v2348_v35 }
 0xa0e   : > { %3351 = vrsqrt.f32 %v2352_v34  ;;  %vm2362_vm14 = vweird.f32 %v2352_v34 }
 0xa11   : > { %v2343_v36 = vpop.xlane.xlu2 %2342 }
 0xa12   : > { %v2349_v9 = vmul.f32 %v2343_v36, %v4045_v10 }
 0xa14   : > { %v3352_v44 = vpop.eup %3351  ;;  %v2353_v19 = vadd.f32 1e-12, %v2349_v9 }
 0xa15   : > { %v2357_v37 = vmul.f32 %v3352_v44, %v2352_v34  ;;  %vm2363_vm13 = vweird.f32 %v3352_v44 }
 0xa16   : > { %3353 = vrsqrt.f32 %v2353_v19  ;;  %vm2364_vm15 = vmor %vm2362_vm14, %vm2363_vm13  ;;  %vm2372_vm1 = vweird.f32 %v2353_v19 }
 0xa17   : > { %v2358_v38 = vmul.f32 %v3352_v44, %v2357_v37 }
 0xa19   : > { %v2359_v8 = vmul.f32 0.5, %v2358_v38 }
 0xa1b   : > { %v2360_v39 = vsub.f32 1.5, %v2359_v8 }
 0xa1c   : > { %v3354_v3 = vpop.eup %3353 }
 0xa1d   : > { %v2361_v40 = vmul.f32 %v3352_v44, %v2360_v39  ;;  %v2367_v24 = vmul.f32 %v3354_v3, %v2353_v19  ;;  %vm2373_vm0 = vweird.f32 %v3354_v3 }
 0xa1e   : > { %vm2374_vm2 = vmor %vm2372_vm1, %vm2373_vm0 }
 0xa1f   : > { %v2365_v15 = vsel %vm2364_vm15, %v3352_v44, %v2361_v40  ;;  %v2368_v42 = vmul.f32 %v3354_v3, %v2367_v24 }
 0xa20   : > { %v2396_v46 = vmul.f32 %v2365_v15, %v2332_v12 }
 0xa21   : > { %v2369_v47 = vmul.f32 0.5, %v2368_v42 }
 0xa22   : > { %v2403_v60 = vmul.f32 %v3291_v41, %v2396_v46 }
 0xa23   : > { %v2370_v48 = vsub.f32 1.5, %v2369_v47 }
 0xa24   : > { %v2410_v58 = vadd.f32 %v3292_v45, %v2403_v60 }
 0xa25   : > { %v2371_v43 = vmul.f32 %v3354_v3, %v2370_v48 }
 0xa26   : > { %2414 = vst [vmem:[#allocation2] sm:$0xff] %v2410_v58 }
 0xa27   : > { %v2375_v49 = vsel %vm2374_vm2, %v3354_v3, %v2371_v43 }
 0xa28   : > { %v2397_v50 = vmul.f32 %v2375_v49, %v2333_v23 }
 0xa2a   : > { %v2404_v52 = vmul.f32 %v3291_v41, %v2397_v50 }
 0xa2c   : > { %v2411_v11 = vadd.f32 %v3292_v45, %v2404_v52 }
 0xa2e   : > { %2415 = vst [vmem:[#allocation2 + $0x8] sm:$0xff] %v2411_v11  ;;  %v2345_v53 = vpop.xlane.xlu0 %2344 }
 0xa2f   : > { %v2350_v18 = vmul.f32 %v2345_v53, %v4045_v10 }
 0xa31   : > { %v2354_v54 = vadd.f32 1e-12, %v2350_v18 }
 0xa33   : > { %3355 = vrsqrt.f32 %v2354_v54  ;;  %vm2382_vm4 = vweird.f32 %v2354_v54 }
 0xa36   : > { %v2347_v55 = vpop.xlane.xlu1 %2346 }
 0xa37   : > { %v2351_v5 = vmul.f32 %v2347_v55, %v4045_v10 }
 0xa39   : > { %v3356_v59 = vpop.eup %3355  ;;  %v2355_v7 = vadd.f32 1e-12, %v2351_v5 }
 0xa3a   : > { %v2377_v20 = vmul.f32 %v3356_v59, %v2354_v54  ;;  %vm2383_vm3 = vweird.f32 %v3356_v59 }
 0xa3b   : > { %3357 = vrsqrt.f32 %v2355_v7  ;;  %vm2384_vm5 = vmor %vm2382_vm4, %vm2383_vm3  ;;  %vm2392_vm7 = vweird.f32 %v2355_v7 }
 0xa3c   : > { %v2378_v61 = vmul.f32 %v3356_v59, %v2377_v20 }
 0xa3e   : > { %v2379_v62 = vmul.f32 0.5, %v2378_v61 }
 0xa40   : > { %v2380_v63 = vsub.f32 1.5, %v2379_v62 }
 0xa41   : > { %v3358_v51 = vpop.eup %3357 }
 0xa42   : > { %v2381_v1 = vmul.f32 %v3356_v59, %v2380_v63  ;;  %v2387_v2 = vmul.f32 %v3358_v51, %v2355_v7  ;;  %vm2393_vm6 = vweird.f32 %v3358_v51 }
 0xa43   : > { %vm2394_vm8 = vmor %vm2392_vm7, %vm2393_vm6 }
 0xa44   : > { %v2385_v28 = vsel %vm2384_vm5, %v3356_v59, %v2381_v1  ;;  %v2388_v4 = vmul.f32 %v3358_v51, %v2387_v2 }
 0xa45   : > { %v2398_v13 = vmul.f32 %v2385_v28, %v4170_v26 }
 0xa46   : > { %v2389_v14 = vmul.f32 0.5, %v2388_v4 }
 0xa47   : > { %v2405_v6 = vmul.f32 %v3291_v41, %v2398_v13 }
 0xa48   : > { %v2390_v10 = vsub.f32 1.5, %v2389_v14 }
 0xa49   : > { %v2412_v16 = vadd.f32 %v3292_v45, %v2405_v6 }
 0xa4a   : > { %v2391_v17 = vmul.f32 %v3358_v51, %v2390_v10 }
 0xa4b   : > { %2416 = vst [vmem:[#allocation2 + $0x10] sm:$0xff] %v2412_v16 }
 0xa4c   : > { %v2395_v12 = vsel %vm2394_vm8, %v3358_v51, %v2391_v17 }
 0xa4d   : > { %v2399_v27 = vmul.f32 %v2395_v12, %v4175_v0 }
 0xa4f   : > { %v2406_v22 = vmul.f32 %v3291_v41, %v2399_v27  ;;  %2421 = sbr.rel (%p3051_p10) target bundleno = 2947 (0xb83), region = 120 }
 0xa51   : > { %v2413_v29 = vadd.f32 %v3292_v45, %v2406_v22 }
 0xa53   : > { %2417 = vst [vmem:[#allocation2 + $0x18] sm:$0xff] %v2413_v29 }
 0xa54   : > { %v3192_v23 = vld [vmem:[%s4339_s29 + $0x38] sm:$0xff]  ;;  %v3191_v25 = vld [vmem:[%s4339_s29 + $0x30] sm:$0xff]  ;;  %v3190_v26 = vld [vmem:[%s4339_s29 + $0x28] sm:$0xff] }
 0xa55   : > { %2492 = vmatpush.bf16.msra.mxu0 %v3192_v23  ;;  %v3200_v21 = vld [vmem:[%s4340_s23 + $0x38] sm:$0xff]  ;;  %v3199_v57 = vld [vmem:[%s4341_s6 + $0x30] sm:$0xff]  ;;  %v3198_v56 = vld [vmem:[%s4341_s6 + $0x28] sm:$0xff] }
 0xa56   : > { %2575 = vmatpush.bf16.msra.mxu1 %v3200_v21  ;;  %v3189_v31 = vld [vmem:[%s4339_s29 + $0x20] sm:$0xff]  ;;  %v3188_v0 = vld [vmem:[%s4339_s29 + $0x18] sm:$0xff]  ;;  %v3187_v33 = vld [vmem:[%s4339_s29 + $0x10] sm:$0xff] }
 0xa57   : > { %v3197_v32 = vld [vmem:[%s4341_s6 + $0x20] sm:$0xff]  ;;  %v3196_v30 = vld [vmem:[%s4341_s6 + $0x18] sm:$0xff]  ;;  %v3186_v35 = vld [vmem:[%s4339_s29 + $0x8] sm:$0xff] }
 0xa58   : > { %v3185_v34 = vld [vmem:[%s4339_s29] sm:$0xff]  ;;  %v3195_v44 = vld [vmem:[%s4341_s6 + $0x10] sm:$0xff]  ;;  %v3194_v19 = vld [vmem:[%s4341_s6 + $0x8] sm:$0xff] }
 0xa59   : > { %2493 = vmatpush.bf16.msra.mxu0 %v3191_v25  ;;  %v3193_v37 = vld [vmem:[%s4341_s6] sm:$0xff] }
 0xa5a   : > { %2576 = vmatpush.bf16.msra.mxu1 %v3199_v57  ;;  %v2422_v36 = vld [vmem:[#allocation2] ss:$8 sm:$0xf] }
 0xa5b   : > { %v2423_v9 = vpack.c.bf16 %v2422_v36, %v2422_v36  ;;  %v3359_v38 = vld [vmem:[%s4342_s30] ss:$0 sm:$0xff] }
 0xa5c   : > { %v3360_v41 = vld [vmem:[%s4343_s18] ss:$0 sm:$0xff] }
 0xa5d   : > { %2494 = vmatpush.bf16.msra.mxu0 %v3190_v26 }
 0xa5e   : > { %2577 = vmatpush.bf16.msra.mxu1 %v3198_v56 }
 0xa61   : > { %2495 = vmatpush.bf16.msra.mxu0 %v3189_v31 }
 0xa62   : > { %2578 = vmatpush.bf16.msra.mxu1 %v3197_v32 }
 0xa65   : > { %2496 = vmatpush.bf16.msra.mxu0 %v3188_v0 }
 0xa66   : > { %2579 = vmatpush.bf16.msra.mxu1 %v3196_v30 }
 0xa69   : > { %2497 = vmatpush.bf16.msra.mxu0 %v3187_v33 }
 0xa6a   : > { %2580 = vmatpush.bf16.msra.mxu1 %v3195_v44 }
 0xa6d   : > { %2498 = vmatpush.bf16.msra.mxu0 %v3186_v35 }
 0xa6e   : > { %2581 = vmatpush.bf16.msra.mxu1 %v3194_v19 }
 0xa71   : > { %2499 = vmatpush.bf16.msra.mxu0 %v3185_v34 }
 0xa72   : > { %2582 = vmatpush.bf16.msra.mxu1 %v3193_v37 }
 0xa74   : > { %2500 = vmatmul.bf16.vlgmr.msra.gmra.mxu0 %v2423_v9 }
 0xaf1   : > { %v2501_v8 = vpop.f32.mrf.mxu0 }
 0xaf2   : > { %v2502_v39 = vadd.f32 %v3359_v38, %v2501_v8 }
 0xaf4   : > { %3361 = vtanh.f32 %v2502_v39 }
 0xaf9   : > { %v2503_v3 = vpop.f32.mrf.mxu0 }
 0xafa   : > { %v3362_v40 = vpop.eup %3361 }
 0xafb   : > { %v2506_v24 = vpack.c.bf16 %v3362_v40, %v3362_v40 }
 0xafd   : > { %2583 = vmatmul.bf16.vlgmr.msra.gmra.mxu1 %v2506_v24 }
 0xb7a   : > { %v2584_v15 = vpop.f32.mrf.mxu1 }
 0xb7b   : > { %v2585_v42 = vadd.f32 %v3360_v41, %v2584_v15 }
 0xb7d   : > { %v2588_v45 = vmax.f32 %v2585_v42, 0.0 }
 0xb7f   : > { %2589 = vst [vmem:[%s4344_s12] sm:$0xf] %v2588_v45 }
 0xb82   : > { %v2586_v46 = vpop.f32.mrf.mxu1 }
 0xb83 PF: > { %s4345_s24 = sld [smem:[#allocation11_spill]]  ;;  %s4348_s1 = smov %s3483_s22 }
 0xb84   : > { %s4346_s20 = sld [smem:[#allocation10_spill]] }
 0xb85   : > { %s4347_s23 = sld [smem:[#allocation12_spill]] }
 0xb89   : > { %p33_p5 = scmp.ge.s32.totalorder %s4345_s24, 4  }
 0xb8a   : > { %s4349_s22 = smov %s4346_s20 }
 0xb8b   :  { %35 = sbr.rel (!%p33_p5) target bundleno = 22 (0x16), region = 195 }
 0xb90   :  { %2601 = vsyncpa [#allocation4], 1 }
 0xb91   :  { %2603 = vsyncpa [#allocation4 + $0x1], 1 }
 0xb92   :  { %2604 = vsyncpa [#allocation6], 1 }
 0xb93   :  { %2606 = vsyncpa [#allocation6 + $0x1], 1 }

</bundles_post_ra>
